<compile_context>
chip_gen: v7x
topology: tpu7x:2x2x1
jax: 0.10.0
libtpu: 0.0.40
codegen_flags: <defaults>
</compile_context>

<pallas_src>
import jax
import jax.numpy as jnp
from jax.experimental import pallas as pl
from jax.experimental.pallas import tpu as pltpu

TILE = 512  # row / reduction tile for the propagation matmul


def _round_up(x, m):
    return ((x + m - 1) // m) * m


def _pad2d(x, rows, cols):
    r, c = x.shape
    if r == rows and c == cols:
        return x
    return jnp.pad(x, ((0, rows - r), (0, cols - c)))


# ----------------------------------------------------------------------------
# Pallas LightGCN propagation step kernel (bf16 in, f32 MXU accumulation)
#   nxt  = A @ E                (returned in bf16, ready to feed the next layer)
#   sum' = sum + A @ E          (fused running layer-sum, f32)
# ----------------------------------------------------------------------------
def _prop_kernel(a_ref, e_ref, s_ref, nxt_ref, sum_ref, acc_ref):
    k = pl.program_id(1)

    @pl.when(k == 0)
    def _():
        acc_ref[...] = jnp.zeros_like(acc_ref)

    acc_ref[...] += jnp.dot(a_ref[...], e_ref[...],
                            preferred_element_type=jnp.float32)

    @pl.when(k == pl.num_programs(1) - 1)
    def _():
        nxt_ref[...] = acc_ref[...].astype(nxt_ref.dtype)   # bf16 feed for next layer
        sum_ref[...] = s_ref[...] + acc_ref[...]            # fused layer accumulation


def pallas_prop_step(a_bf16, e_bf16, sum_f32):
    """Returns (nxt_bf16, new_sum_f32) for nxt = A @ E, new_sum = sum + nxt."""
    Mp, Kp = a_bf16.shape
    Kp2, D = e_bf16.shape
    assert Kp == Kp2 and Mp % TILE == 0 and Kp % TILE == 0
    grid = (Mp // TILE, Kp // TILE)
    return pl.pallas_call(
        _prop_kernel,
        out_shape=(jax.ShapeDtypeStruct((Mp, D), jnp.bfloat16),
                   jax.ShapeDtypeStruct((Mp, D), jnp.float32)),
        grid_spec=pltpu.PrefetchScalarGridSpec(
            num_scalar_prefetch=0,
            grid=grid,
            in_specs=[
                pl.BlockSpec((TILE, TILE), lambda i, k: (i, k)),  # adjacency tile (bf16)
                pl.BlockSpec((TILE, D), lambda i, k: (k, 0)),     # embedding block (bf16)
                pl.BlockSpec((TILE, D), lambda i, k: (i, 0)),     # running sum (f32)
            ],
            out_specs=(
                pl.BlockSpec((TILE, D), lambda i, k: (i, 0)),     # next-layer emb (bf16)
                pl.BlockSpec((TILE, D), lambda i, k: (i, 0)),     # updated sum (f32)
            ),
            scratch_shapes=[pltpu.VMEM((TILE, D), jnp.float32)],
        ),
        compiler_params=pltpu.CompilerParams(
            dimension_semantics=("parallel", "arbitrary")),
    )(a_bf16, e_bf16, sum_f32)


# ----------------------------------------------------------------------------
# Pallas BPR loss kernel (sampled embeddings only; regularizer arrives as one
# SMEM scalar so the full embedding tables never enter VMEM)
# ----------------------------------------------------------------------------
def _make_bpr_kernel(reg_weight):
    def kernel(reg_ref, pu_ref, pi_ref, nu_ref, ni_ref, o_ref):
        p_score = jnp.sum(pu_ref[...] * pi_ref[...], axis=-1, keepdims=True)   # (B,1)
        n_score = jnp.sum(jnp.sum(nu_ref[...] * ni_ref[...], axis=-1),
                          axis=-1, keepdims=True)                              # (B,1)
        scores = p_score - n_score
        bpr = -jnp.log(1e-10 + jax.nn.sigmoid(scores))                         # (B,1)
        bpr_loss = jnp.sum(bpr, axis=0, keepdims=True) / scores.shape[0]       # (1,1)
        o_ref[...] = bpr_loss + reg_weight * reg_ref[0]
    return kernel


def pallas_bpr_loss(p_u, p_i, n_u, n_i, emb_reg, reg_weight):
    reg = jnp.asarray(emb_reg, jnp.float32).reshape(1)
    out = pl.pallas_call(
        _make_bpr_kernel(float(reg_weight)),
        out_shape=jax.ShapeDtypeStruct((1, 1), jnp.float32),
        in_specs=[pl.BlockSpec(memory_space=pltpu.MemorySpace.SMEM)]
        + [pl.BlockSpec(memory_space=pltpu.MemorySpace.VMEM)] * 4,
        out_specs=pl.BlockSpec(memory_space=pltpu.MemorySpace.VMEM),
    )(reg, p_u, p_i, n_u, n_i)
    return out[0, 0]


# ----------------------------------------------------------------------------
# Forward pass (Pallas hot path + plain-XLA glue)
# ----------------------------------------------------------------------------
def mbcgcn_forward_pallas(params, R_list, x, cfg):
    n_u = cfg["n_users"] + 1
    n_i = cfg["n_items"] + 1
    layers, b_cnt, D = cfg["layers"], cfg["b_cnt"], cfg["emb"]

    Up = _round_up(n_u, TILE)
    Ip = _round_up(n_i, TILE)

    # pad + bf16-cast the bipartite adjacency quadrants ONCE (not per call)
    R_bf = [_pad2d(R, Up, Ip).astype(jnp.bfloat16) for R in R_list]
    RT_bf = [_pad2d(R.T, Ip, Up).astype(jnp.bfloat16) for R in R_list]

    u_in = _pad2d(params["user_emb"], Up, D)    # f32, zero-padded rows
    i_in = _pad2d(params["item_emb"], Ip, D)

    gcn_u, gcn_i = [], []
    for b in range(b_cnt):
        u_cur = u_in.astype(jnp.bfloat16)
        i_cur = i_in.astype(jnp.bfloat16)
        u_sum, i_sum = u_in, i_in               # layer-0 contribution (f32)
        for _ in range(layers):
            u_nxt, u_sum = pallas_prop_step(R_bf[b], i_cur, u_sum)
            i_nxt, i_sum = pallas_prop_step(RT_bf[b], u_cur, i_sum)
            u_cur, i_cur = u_nxt, i_nxt
        inv = 1.0 / (layers + 1)
        u_mean = u_sum * inv
        i_mean = i_sum * inv
        gcn_u.append(u_mean)
        gcn_i.append(i_mean)
        if b < b_cnt - 1:
            # tiny nn.Linear (no bias, 32x32 weights): launch-overhead bound in
            # Pallas -> plain XLA dot (zero-padded rows stay zero).
            u_in = jnp.dot(u_mean, params["user_W"][b].T)
            i_in = jnp.dot(i_mean, params["item_W"][b].T)

    user_embedding = sum(gcn_u)[:n_u]
    item_embedding = sum(gcn_i)[:n_i]

    # sample slicing (B, 2+neg, 4): row 0 positive, rows 1..-2 negatives, last = signal
    p_sample = x[:, 0, :]
    n_sample = x[:, 1:-1, :].reshape(-1, 4)
    B = p_sample.shape[0]
    neg = n_sample.shape[0] // B

    p_u = user_embedding[p_sample[:, 0]]                    # (B, D)
    p_i = item_embedding[p_sample[:, 1]]                    # (B, D)
    n_u_e = user_embedding[n_sample[:, 0]].reshape(B, neg, D)
    n_i_e = item_embedding[n_sample[:, 1]].reshape(B, neg, D)

    # EmbLoss on the RAW tables, computed in plain XLA (trivially cheap) and
    # passed to the BPR kernel as a single SMEM scalar.
    emb_reg = (jnp.linalg.norm(params["user_emb"]) +
               jnp.linalg.norm(params["item_emb"])) / float(n_i)

    return pallas_bpr_loss(p_u, p_i, n_u_e, n_i_e, emb_reg, cfg["reg_weight"])


# ----------------------------------------------------------------------------
# Pure-JAX references (bf16-policy mirror for a tight check, pure f32 for a
# loose check against the original module semantics)
# ----------------------------------------------------------------------------
def _ref_prop(R, e, use_bf16):
    if use_bf16:
        return jnp.dot(R.astype(jnp.bfloat16), e.astype(jnp.bfloat16),
                       preferred_element_type=jnp.float32)
    return jnp.dot(R, e, preferred_element_type=jnp.float32)


def mbcgcn_forward_ref(params, R_list, x, cfg, use_bf16):
    n_i = cfg["n_items"] + 1
    layers, b_cnt, D = cfg["layers"], cfg["b_cnt"], cfg["emb"]

    u_in, i_in = params["user_emb"], params["item_emb"]
    gcn_u, gcn_i = [], []
    for b in range(b_cnt):
        R = R_list[b]
        u_cur, i_cur = u_in, i_in
        u_sum, i_sum = u_in, i_in
        for _ in range(layers):
            u_nxt = _ref_prop(R, i_cur, use_bf16)
            i_nxt = _ref_prop(R.T, u_cur, use_bf16)
            u_sum = u_sum + u_nxt
            i_sum = i_sum + i_nxt
            u_cur, i_cur = u_nxt, i_nxt
        inv = 1.0 / (layers + 1)
        u_mean, i_mean = u_sum * inv, i_sum * inv
        gcn_u.append(u_mean)
        gcn_i.append(i_mean)
        if b < b_cnt - 1:
            u_in = jnp.dot(u_mean, params["user_W"][b].T)
            i_in = jnp.dot(i_mean, params["item_W"][b].T)

    user_embedding = sum(gcn_u)
    item_embedding = sum(gcn_i)

    p_sample = x[:, 0, :]
    n_sample = x[:, 1:-1, :].reshape(-1, 4)
    p_u = user_embedding[p_sample[:, 0]]
    p_i = item_embedding[p_sample[:, 1]]
    n_u_e = user_embedding[n_sample[:, 0]]
    n_i_e = item_embedding[n_sample[:, 1]]

    p_score = jnp.sum(p_u * p_i, axis=-1)
    n_score = jnp.sum(n_u_e * n_i_e, axis=-1).reshape(p_sample.shape[0], -1).sum(-1)
    scores = p_score - n_score
    bpr_loss = jnp.mean(-jnp.log(1e-10 + jax.nn.sigmoid(scores)))
    emb_loss = (jnp.linalg.norm(params["user_emb"]) +
                jnp.linalg.norm(params["item_emb"])) / float(n_i)
    return bpr_loss + cfg["reg_weight"] * emb_loss


# ----------------------------------------------------------------------------
# Deterministic setup
# ----------------------------------------------------------------------------
def build_norm_adj(key, n_u_rows, n_i_rows, density=0.2):
    N = n_u_rows + n_i_rows
    r = jax.random.uniform(key, (n_u_rows, n_i_rows))
    R = (r < density).astype(jnp.float32)
    R = R.at[0, :].set(0.0).at[:, 0].set(0.0)          # padding idx 0 has no edges
    A = jnp.zeros((N, N), jnp.float32)
    A = A.at[:n_u_rows, n_u_rows:].set(R)
    A = A.at[n_u_rows:, :n_u_rows].set(R.T)
    deg = jnp.sum(A, axis=1)
    d_inv_sqrt = jnp.where(deg > 0, 1.0 / jnp.sqrt(jnp.maximum(deg, 1e-12)), 0.0)
    return A * d_inv_sqrt[:, None] * d_inv_sqrt[None, :]


def xavier_uniform(key, shape):
    fan_in, fan_out = shape[1], shape[0]
    limit = (6.0 / (fan_in + fan_out)) ** 0.5
    return jax.random.uniform(key, shape, jnp.float32, -limit, limit)


def xavier_normal(key, shape):
    fan_in, fan_out = shape[1], shape[0]
    std = (2.0 / (fan_in + fan_out)) ** 0.5
    return std * jax.random.normal(key, shape, jnp.float32)


if __name__ == "__main__":
    cfg = dict(n_users=63, n_items=63, emb=32, layers=2, b_cnt=2, reg_weight=0.01)
    B, neg = 2, 2

    key = jax.random.PRNGKey(0)
    k_ue, k_ie, k_uw, k_iw, k_a0, k_a1, k_xu, k_xi = jax.random.split(key, 8)

    n_u_rows = cfg["n_users"] + 1
    n_i_rows = cfg["n_items"] + 1

    params = {
        "user_emb": xavier_uniform(k_ue, (n_u_rows, cfg["emb"])),
        "item_emb": xavier_uniform(k_ie, (n_i_rows, cfg["emb"])),
        "user_W": [xavier_normal(k_uw, (cfg["emb"], cfg["emb"]))
                   for _ in range(cfg["b_cnt"] - 1)],
        "item_W": [xavier_normal(k_iw, (cfg["emb"], cfg["emb"]))
                   for _ in range(cfg["b_cnt"] - 1)],
    }

    # behavior adjacencies; replicate the __init__ ordering:
    # auxiliary behaviors (matrix 1..b_cnt-1) first, target behavior (matrix 0) last.
    adj_mats = [build_norm_adj(k_a0, n_u_rows, n_i_rows),
                build_norm_adj(k_a1, n_u_rows, n_i_rows)]
    adjs = adj_mats[1:] + adj_mats[:1]
    # exploit the bipartite structure: only keep the user-item quadrant R
    R_list = [A[:n_u_rows, n_u_rows:] for A in adjs]

    # x: (B, 2 + neg, 4) = [user_id, item_id, behavior, signal]
    u_ids = jax.random.randint(k_xu, (B, 2 + neg, 1), 1, cfg["n_users"] + 1)
    i_ids = jax.random.randint(k_xi, (B, 2 + neg, 1), 1, cfg["n_items"] + 1)
    extra = jnp.zeros((B, 2 + neg, 2), jnp.int32)
    x = jnp.concatenate([u_ids, i_ids, extra], axis=-1).astype(jnp.int32)

    # Pallas forward
    loss = mbcgcn_forward_pallas(params, R_list, x, cfg)
    loss = jax.block_until_ready(loss)

    # tight check vs a reference that mirrors the bf16-input / f32-accum policy
    ref_bf16 = jax.block_until_ready(
        mbcgcn_forward_ref(params, R_list, x, cfg, use_bf16=True))
    # loose check vs the original full-f32 semantics
    ref_f32 = jax.block_until_ready(
        mbcgcn_forward_ref(params, R_list, x, cfg, use_bf16=False))

    assert jnp.isfinite(loss), "loss is not finite"
    assert jnp.allclose(loss, ref_bf16, rtol=1e-3, atol=1e-5), (loss, ref_bf16)
    assert jnp.allclose(loss, ref_f32, rtol=2e-2, atol=1e-3), (loss, ref_f32)
    print("KERNEL_OK")
</pallas_src>

<mosaic_0001>
module attributes {stable_mosaic.version = 11 : i64} {
  func.func @_prop_kernel(%arg0: i32, %arg1: i32, %arg2: memref<512x512xbf16, #tpu.memory_space<vmem>>, %arg3: memref<512x32xbf16, #tpu.memory_space<vmem>>, %arg4: memref<512x32xf32, #tpu.memory_space<vmem>>, %arg5: memref<512x32xbf16, #tpu.memory_space<vmem>>, %arg6: memref<512x32xf32, #tpu.memory_space<vmem>>, %arg7: memref<512x32xf32, #tpu.memory_space<vmem>>) attributes {dimension_semantics = [#tpu.dimension_semantics<parallel>, #tpu.dimension_semantics<arbitrary>], iteration_bounds = array<i64: 1, 1>, scalar_prefetch = 0 : i64, scratch_operands = 1 : i64, tpu.core_type = #tpu.core_type<tc>, window_params = [{transform_indices = @transform_0, window_bounds = array<i64: 512, 512>}, {transform_indices = @transform_1, window_bounds = array<i64: 512, 32>}, {transform_indices = @transform_2, window_bounds = array<i64: 512, 32>}, {transform_indices = @transform_3, window_bounds = array<i64: 512, 32>}, {transform_indices = @transform_4, window_bounds = array<i64: 512, 32>}]} {
    %c0_i32 = arith.constant 0 : i32
    %0 = arith.cmpi eq, %arg1, %c0_i32 : i32
    %1 = arith.extui %0 : i1 to i32
    %c0_i32_0 = arith.constant 0 : i32
    %2 = arith.cmpi ne, %1, %c0_i32_0 : i32
    scf.if %2 {
      %cst_10 = arith.constant 0.000000e+00 : f32
      %12 = vector.broadcast %cst_10 : f32 to vector<512x32xf32>
      %c0_11 = arith.constant 0 : index
      %c0_12 = arith.constant 0 : index
      %13 = vector.load %arg7[%c0_11, %c0_12] : memref<512x32xf32, #tpu.memory_space<vmem>>, vector<512x32xf32>
      tpu.vector_store %arg7[%c0_11, %c0_12], %12 {strides = array<i32>} : memref<512x32xf32, #tpu.memory_space<vmem>>, vector<512x32xf32>,
    } else {
    }
    %c0 = arith.constant 0 : index
    %c0_1 = arith.constant 0 : index
    %3 = vector.load %arg7[%c0, %c0_1] : memref<512x32xf32, #tpu.memory_space<vmem>>, vector<512x32xf32>
    %c0_2 = arith.constant 0 : index
    %c0_3 = arith.constant 0 : index
    %4 = vector.load %arg2[%c0_2, %c0_3] : memref<512x512xbf16, #tpu.memory_space<vmem>>, vector<512x512xbf16>
    %c0_4 = arith.constant 0 : index
    %c0_5 = arith.constant 0 : index
    %5 = vector.load %arg3[%c0_4, %c0_5] : memref<512x32xbf16, #tpu.memory_space<vmem>>, vector<512x32xbf16>
    %cst = arith.constant dense<0.000000e+00> : vector<512x32xf32>
    %6 = tpu.matmul %4, %5, %cst {dimension_numbers = #tpu.dot_dimension_numbers<[1], [0], [0], [1], [0, 0, 1, 1], [], []>} : vector<512x512xbf16>, vector<512x32xbf16>, vector<512x32xf32> -> vector<512x32xf32>
    %7 = arith.addf %3, %6 : vector<512x32xf32>
    %c0_6 = arith.constant 0 : index
    %c0_7 = arith.constant 0 : index
    %8 = vector.load %arg7[%c0_6, %c0_7] : memref<512x32xf32, #tpu.memory_space<vmem>>, vector<512x32xf32>
    tpu.vector_store %arg7[%c0_6, %c0_7], %7 {strides = array<i32>} : memref<512x32xf32, #tpu.memory_space<vmem>>, vector<512x32xf32>,
    %c0_i32_8 = arith.constant 0 : i32
    %9 = arith.cmpi eq, %arg1, %c0_i32_8 : i32
    %10 = arith.extui %9 : i1 to i32
    %c0_i32_9 = arith.constant 0 : i32
    %11 = arith.cmpi ne, %10, %c0_i32_9 : i32
    scf.if %11 {
      %c0_10 = arith.constant 0 : index
      %c0_11 = arith.constant 0 : index
      %12 = vector.load %arg7[%c0_10, %c0_11] : memref<512x32xf32, #tpu.memory_space<vmem>>, vector<512x32xf32>
      %13 = arith.truncf %12 : vector<512x32xf32> to vector<512x32xbf16>
      %c0_12 = arith.constant 0 : index
      %c0_13 = arith.constant 0 : index
      %14 = vector.load %arg5[%c0_12, %c0_13] : memref<512x32xbf16, #tpu.memory_space<vmem>>, vector<512x32xbf16>
      tpu.vector_store %arg5[%c0_12, %c0_13], %13 {strides = array<i32>} : memref<512x32xbf16, #tpu.memory_space<vmem>>, vector<512x32xbf16>,
      %c0_14 = arith.constant 0 : index
      %c0_15 = arith.constant 0 : index
      %15 = vector.load %arg4[%c0_14, %c0_15] : memref<512x32xf32, #tpu.memory_space<vmem>>, vector<512x32xf32>
      %c0_16 = arith.constant 0 : index
      %c0_17 = arith.constant 0 : index
      %16 = vector.load %arg7[%c0_16, %c0_17] : memref<512x32xf32, #tpu.memory_space<vmem>>, vector<512x32xf32>
      %17 = arith.addf %15, %16 : vector<512x32xf32>
      %c0_18 = arith.constant 0 : index
      %c0_19 = arith.constant 0 : index
      %18 = vector.load %arg6[%c0_18, %c0_19] : memref<512x32xf32, #tpu.memory_space<vmem>>, vector<512x32xf32>
      tpu.vector_store %arg6[%c0_18, %c0_19], %17 {strides = array<i32>} : memref<512x32xf32, #tpu.memory_space<vmem>>, vector<512x32xf32>,
    } else {
    }
    return
  }
  func.func @transform_0(%arg0: i32, %arg1: i32) -> (i32, i32) {
    %c0_i32 = arith.constant 0 : i32
    return %arg0, %arg1 : i32, i32
  }
  func.func @transform_1(%arg0: i32, %arg1: i32) -> (i32, i32) {
    %c0_i32 = arith.constant 0 : i32
    %c0_i32_0 = arith.constant 0 : i32
    return %arg1, %c0_i32 : i32, i32
  }
  func.func @transform_2(%arg0: i32, %arg1: i32) -> (i32, i32) {
    %c0_i32 = arith.constant 0 : i32
    %c0_i32_0 = arith.constant 0 : i32
    return %arg0, %c0_i32 : i32, i32
  }
  func.func @transform_3(%arg0: i32, %arg1: i32) -> (i32, i32) {
    %c0_i32 = arith.constant 0 : i32
    %c0_i32_0 = arith.constant 0 : i32
    return %arg0, %c0_i32 : i32, i32
  }
  func.func @transform_4(%arg0: i32, %arg1: i32) -> (i32, i32) {
    %c0_i32 = arith.constant 0 : i32
    %c0_i32_0 = arith.constant 0 : i32
    return %arg0, %c0_i32 : i32, i32
  }
}

</mosaic_0001>

<bundles_post_ra>
// kernel: tpu_custom_call.1
= control target key start
LH: loop header
LB: loop body
LE: loop exit
PB: predicated region body
PF: predicated region fallthrough
CT: control target
= control target key end

     0   :  { %10 = vsyncpa [#allocation4], 0  ;;  %s3089_s15 = smov [#allocation3]   ;;  %s4167_s0 = inlined_call_operand.hbm [shape: bf16[512,512], index: 0, kind: input, shape index: {}]   ;;  %s4168_s1 = inlined_call_operand.vmem [shape: bf16[512,32], index: 1, kind: input, shape index: {}]   ;;  %s4169_s2 = inlined_call_operand.vmem [shape: f32[512,32], index: 2, kind: input, shape index: {}]   ;;  %s4170_s3 = inlined_call_operand.vmem [shape: bf16[512,32], index: 3, kind: output, shape index: {0}]   ;;  %s4171_s4 = inlined_call_operand.vmem [shape: f32[512,32], index: 4, kind: output, shape index: {1}]  }
   0x1   :  { %s16_s16 = sshll.u32 %s3089_s15, 4  ;;  %s3065_s19 = scalar_lea.hbm %s4167_s0, 16384  ;;  %s17_s16 = int_to_ptr.vmem [resolvable:$true] %s16_s16 }
   0x2   :  { %p3066_p0 = scmp.ne.s32.totalorder %s4167_s0, %s3065_s19  ;;  %p3069_p1 = scmp.lt.u32.totalorder %s3065_s19, %s4167_s0 }
   0x4   :  { %p3071_p2 = pnand %p3069_p1, %p3066_p0 }
   0x6   :  { %3074 = shalt.err (!%p3071_p2)
}
   0x7   :  { %s3075_s24 = scalar_lea.vmem %s17_s16, 16384  ;;  %p3080_p4 = scmp.lt.s32.totalorder %s17_s16, %s17_s16 }
   0x8   :  { %p3076_p3 = scmp.ne.s32.totalorder %s17_s16, %s3075_s24  ;;  %p3081_p5 = scmp.lt.s32.totalorder %s3075_s24, %s3075_s24 }
   0xa   :  { %p3082_p6 = por %p3081_p5, %p3080_p4 }
   0xc   :  { %p3083_p7 = pnand %p3082_p6, %p3076_p3 }
   0xe   :  { %3086 = shalt.err (!%p3083_p7)
}
   0xf   :  { %s3090_s25 = smov 256   ;;  %s3091_s26 = smov 16  }
  0x10   :  { %22 = dma.hbm_to_vmem [thread:$0]  %s4167_s0, 16384, %s17_s16, [#allocation4], %s3090_s25, %s3090_s25, %s3091_s26  }
  0x11   :  { %3087 = dma.done.wait [#allocation4], 16384  }
  0x12   :  { %3088 = vsyncadd [#allocation4], 4294950912  ;;  %v3092_v0 = vmov 0   ;;  %v2841_v1 = vld [vmem:[%s4168_s1] sm:$0xff]   ;;  %v2843_v3 = vld [vmem:[%s4168_s1 + $0x8] sm:$0xff]   ;;  %vm35_vm0 = vcmask 261120  }
  0x13   :  { %1188 = vmatprep.subr.bf16.mxu0 %v3092_v0  ;;  %1477 = vmatprep.subr.bf16.mxu1 %v3092_v0  ;;  %v2842_v2 = vld [vmem:[%s4168_s1 + $0x80] sm:$0xff]   ;;  %v2844_v4 = vld [vmem:[%s4168_s1 + $0x88] sm:$0xff]   ;;  %v2845_v5 = vld [vmem:[%s4168_s1 + $0x10] sm:$0xff]   ;;  %vm2218_vm1 = vcmask 257024  }
  0x14   :  { %1189 = vmatpush1.bf16.msra.mxu0 %v2841_v1  ;;  %1478 = vmatpush1.bf16.msra.mxu1 %v2842_v2  ;;  %v2846_v6 = vld [vmem:[%s4168_s1 + $0x90] sm:$0xff]   ;;  %v2847_v7 = vld [vmem:[%s4168_s1 + $0x18] sm:$0xff]   ;;  %v2849_v9 = vld [vmem:[%s4168_s1 + $0x20] sm:$0xff]  }
  0x15   :  { %1190 = vmatprep.subr.bf16.mxu0 %v3092_v0  ;;  %1479 = vmatprep.subr.bf16.mxu1 %v3092_v0  ;;  %v2848_v8 = vld [vmem:[%s4168_s1 + $0x98] sm:$0xff]   ;;  %v2850_v10 = vld [vmem:[%s4168_s1 + $0xa0] sm:$0xff]   ;;  %v2851_v11 = vld [vmem:[%s4168_s1 + $0x28] sm:$0xff]  }
  0x16   :  { %v2852_v12 = vld [vmem:[%s4168_s1 + $0xa8] sm:$0xff]   ;;  %v2853_v13 = vld [vmem:[%s4168_s1 + $0x30] sm:$0xff]   ;;  %v2855_v15 = vld [vmem:[%s4168_s1 + $0x38] sm:$0xff]  }
  0x17   :  { %v2854_v14 = vld [vmem:[%s4168_s1 + $0xb0] sm:$0xff]   ;;  %v2856_v16 = vld [vmem:[%s4168_s1 + $0xb8] sm:$0xff]   ;;  %v2857_v17 = vld [vmem:[%s4168_s1 + $0x40] sm:$0xff]  }
  0x18   :  { %1191 = vmatpush1.bf16.msra.mxu0 %v2843_v3  ;;  %1480 = vmatpush1.bf16.msra.mxu1 %v2844_v4  ;;  %v2858_v18 = vld [vmem:[%s4168_s1 + $0xc0] sm:$0xff]   ;;  %v2859_v20 = vld [vmem:[%s4168_s1 + $0x48] sm:$0xff]   ;;  %v2861_v23 = vld [vmem:[%s4168_s1 + $0x50] sm:$0xff]  }
  0x19   :  { %1192 = vmatprep.subr.bf16.mxu0 %v3092_v0  ;;  %1481 = vmatprep.subr.bf16.mxu1 %v3092_v0  ;;  %v2875_v19 = vld [vmem:[#allocation3 + $0x4] ss:$16 sps:$4 sm:$0xff]   ;;  %v2878_v21 = vld [vmem:[#allocation3 + $0xc] ss:$16 sps:$4 sm:$0xff]   ;;  %v2873_v35 = vld [vmem:[#allocation3] ss:$16 sps:$4 sm:$0xff]  }
  0x1a   :  { %v2860_v22 = vld [vmem:[%s4168_s1 + $0xc8] sm:$0xff]   ;;  %1220 = vmatprep.mubr.bf16.mxu0 %v2875_v19  ;;  %1509 = vmatprep.mubr.bf16.mxu1 %v2878_v21  ;;  %v2862_v24 = vld [vmem:[%s4168_s1 + $0xd0] sm:$0xff]   ;;  %v2863_v25 = vld [vmem:[%s4168_s1 + $0x58] sm:$0xff]  }
  0x1b   :  { %v2864_v26 = vld [vmem:[%s4168_s1 + $0xd8] sm:$0xff]   ;;  %v2865_v27 = vld [vmem:[%s4168_s1 + $0x60] sm:$0xff]   ;;  %v2867_v29 = vld [vmem:[%s4168_s1 + $0x68] sm:$0xff]  }
  0x1c   :  { %1193 = vmatpush1.bf16.msra.mxu0 %v2845_v5  ;;  %1482 = vmatpush1.bf16.msra.mxu1 %v2846_v6  ;;  %v2866_v28 = vld [vmem:[%s4168_s1 + $0xe0] sm:$0xff]   ;;  %v2868_v30 = vld [vmem:[%s4168_s1 + $0xe8] sm:$0xff]   ;;  %v2869_v31 = vld [vmem:[%s4168_s1 + $0x70] sm:$0xff]  }
  0x1d   :  { %1194 = vmatprep.subr.bf16.mxu0 %v3092_v0  ;;  %1483 = vmatprep.subr.bf16.mxu1 %v3092_v0  ;;  %v2870_v32 = vld [vmem:[%s4168_s1 + $0xf0] sm:$0xff]   ;;  %v2871_v33 = vld [vmem:[%s4168_s1 + $0x78] sm:$0xff]  }
  0x1e   :  { %v2872_v34 = vld [vmem:[%s4168_s1 + $0xf8] sm:$0xff]   ;;  %v2879_v37 = vld [vmem:[#allocation3 + $0x24] ss:$16 sps:$4 sm:$0xff]   ;;  %v2883_v39 = vld [vmem:[#allocation3 + $0x20] ss:$16 sps:$4 sm:$0xff]  }
  0x1f   :  { %v2876_v36 = vld [vmem:[#allocation3 + $0x8] ss:$16 sps:$4 sm:$0xff]   ;;  %v2881_v38 = vld [vmem:[#allocation3 + $0x2c] ss:$16 sps:$4 sm:$0xff]   ;;  %v2885_v41 = vld [vmem:[#allocation3 + $0x44] ss:$16 sps:$4 sm:$0xff]  }
  0x20   :  { %1195 = vmatpush1.bf16.msra.mxu0 %v2847_v7  ;;  %1484 = vmatpush1.bf16.msra.mxu1 %v2848_v8  ;;  %v2884_v40 = vld [vmem:[#allocation3 + $0x28] ss:$16 sps:$4 sm:$0xff]   ;;  %v2887_v42 = vld [vmem:[#allocation3 + $0x4c] ss:$16 sps:$4 sm:$0xff]   ;;  %v2889_v43 = vld [vmem:[#allocation3 + $0x40] ss:$16 sps:$4 sm:$0xff]  }
  0x21   :  { %1196 = vmatprep.subr.bf16.mxu0 %v3092_v0  ;;  %1485 = vmatprep.subr.bf16.mxu1 %v3092_v0  ;;  %v2890_v44 = vld [vmem:[#allocation3 + $0x48] ss:$16 sps:$4 sm:$0xff]   ;;  %v2891_v45 = vld [vmem:[#allocation3 + $0x64] ss:$16 sps:$4 sm:$0xff]   ;;  %v2893_v46 = vld [vmem:[#allocation3 + $0x6c] ss:$16 sps:$4 sm:$0xff]  }
  0x22   :  { %v2895_v47 = vld [vmem:[#allocation3 + $0x60] ss:$16 sps:$4 sm:$0xff]   ;;  %v2896_v48 = vld [vmem:[#allocation3 + $0x68] ss:$16 sps:$4 sm:$0xff]   ;;  %v2897_v49 = vld [vmem:[#allocation3 + $0x84] ss:$16 sps:$4 sm:$0xff]  }
  0x23   :  { %v2899_v50 = vld [vmem:[#allocation3 + $0x8c] ss:$16 sps:$4 sm:$0xff]   ;;  %v2901_v51 = vld [vmem:[#allocation3 + $0x80] ss:$16 sps:$4 sm:$0xff]   ;;  %v2902_v52 = vld [vmem:[#allocation3 + $0x88] ss:$16 sps:$4 sm:$0xff]  }
  0x24   :  { %1197 = vmatpush1.bf16.msra.mxu0 %v2849_v9  ;;  %1486 = vmatpush1.bf16.msra.mxu1 %v2850_v10  ;;  %v2903_v53 = vld [vmem:[#allocation3 + $0xa4] ss:$16 sps:$4 sm:$0xff]   ;;  %v2905_v54 = vld [vmem:[#allocation3 + $0xac] ss:$16 sps:$4 sm:$0xff]   ;;  %v2907_v55 = vld [vmem:[#allocation3 + $0xa0] ss:$16 sps:$4 sm:$0xff]  }
  0x25   :  { %1198 = vmatprep.subr.bf16.mxu0 %v3092_v0  ;;  %1487 = vmatprep.subr.bf16.mxu1 %v3092_v0  ;;  %v2908_v56 = vld [vmem:[#allocation3 + $0xa8] ss:$16 sps:$4 sm:$0xff]   ;;  %v2909_v57 = vld [vmem:[#allocation3 + $0xc4] ss:$16 sps:$4 sm:$0xff]   ;;  %v2911_v58 = vld [vmem:[#allocation3 + $0xcc] ss:$16 sps:$4 sm:$0xff]  }
  0x26   :  { %v2913_v59 = vld [vmem:[#allocation3 + $0xc0] ss:$16 sps:$4 sm:$0xff]   ;;  %v2914_v60 = vld [vmem:[#allocation3 + $0xc8] ss:$16 sps:$4 sm:$0xff]   ;;  %v2915_v61 = vld [vmem:[#allocation3 + $0xe4] ss:$16 sps:$4 sm:$0xff]  }
  0x27   :  { %v2917_v62 = vld [vmem:[#allocation3 + $0xec] ss:$16 sps:$4 sm:$0xff]   ;;  %v2919_v63 = vld [vmem:[#allocation3 + $0xe0] ss:$16 sps:$4 sm:$0xff]   ;;  %v2921_v1 = vld [vmem:[#allocation3 + $0x104] ss:$16 sps:$4 sm:$0xff]  }
  0x28   :  { %1199 = vmatpush1.bf16.msra.mxu0 %v2851_v11  ;;  %1488 = vmatpush1.bf16.msra.mxu1 %v2852_v12  ;;  %v2923_v2 = vld [vmem:[#allocation3 + $0x10c] ss:$16 sps:$4 sm:$0xff]   ;;  %v2925_v3 = vld [vmem:[#allocation3 + $0x100] ss:$16 sps:$4 sm:$0xff]   ;;  %v2926_v4 = vld [vmem:[#allocation3 + $0x108] ss:$16 sps:$4 sm:$0xff]  }
  0x29   :  { %1200 = vmatprep.subr.bf16.mxu0 %v3092_v0  ;;  %1489 = vmatprep.subr.bf16.mxu1 %v3092_v0  ;;  %v2927_v5 = vld [vmem:[#allocation3 + $0x124] ss:$16 sps:$4 sm:$0xff]   ;;  %v2929_v6 = vld [vmem:[#allocation3 + $0x12c] ss:$16 sps:$4 sm:$0xff]   ;;  %v2931_v7 = vld [vmem:[#allocation3 + $0x120] ss:$16 sps:$4 sm:$0xff]  }
  0x2a   :  { %v2932_v8 = vld [vmem:[#allocation3 + $0x128] ss:$16 sps:$4 sm:$0xff]   ;;  %v2933_v9 = vld [vmem:[#allocation3 + $0x144] ss:$16 sps:$4 sm:$0xff]   ;;  %v2935_v10 = vld [vmem:[#allocation3 + $0x14c] ss:$16 sps:$4 sm:$0xff]  }
  0x2b   :  { %v3259_v11 = vld [vmem:[#allocation3 + $0x140] ss:$16 sps:$4 sm:$0xff]   ;;  %v3261_v12 = vld [vmem:[#allocation3 + $0x148] ss:$16 sps:$4 sm:$0xff]   ;;  %v2947_v19 = vld [vmem:[#allocation3 + $0x18c] ss:$16 sps:$4 sm:$0xff]  }
  0x2c   :  { %1201 = vmatpush1.bf16.msra.mxu0 %v2853_v13  ;;  %1490 = vmatpush1.bf16.msra.mxu1 %v2854_v14  ;;  %v3263_v13 = vld [vmem:[#allocation3 + $0x164] ss:$16 sps:$4 sm:$0xff]   ;;  %v3265_v14 = vld [vmem:[#allocation3 + $0x16c] ss:$16 sps:$4 sm:$0xff]   ;;  %v2950_v21 = vld [vmem:[#allocation3 + $0x188] ss:$16 sps:$4 sm:$0xff]  }
  0x2d   :  { %1202 = vmatprep.subr.bf16.mxu0 %v3092_v0  ;;  %1491 = vmatprep.subr.bf16.mxu1 %v3092_v0 }
  0x30   :  { %1203 = vmatpush1.bf16.msra.mxu0 %v2855_v15  ;;  %1492 = vmatpush1.bf16.msra.mxu1 %v2856_v16  ;;  %v3093_v15 = vmov 0.0   ;;  %v2943_v16 = vld [vmem:[#allocation3 + $0x160] ss:$16 sps:$4 sm:$0xff]  }
  0x31   :  { %1204 = vmatprep.subr.bf16.mxu0 %v3092_v0  ;;  %1493 = vmatprep.subr.bf16.mxu1 %v3092_v0  ;;  %36 = vst.msk [vmem:[#allocation2] sm:$0xff] %vm35_vm0, %v3093_v15  ;;  %37 = vst.msk [vmem:[#allocation2 + $0x8] sm:$0xff] %vm35_vm0, %v3093_v15 }
  0x32   :  { %38 = vst.msk [vmem:[#allocation2 + $0x10] sm:$0xff] %vm35_vm0, %v3093_v15  ;;  %39 = vst.msk [vmem:[#allocation2 + $0x18] sm:$0xff] %vm35_vm0, %v3093_v15 }
  0x33   :  { %40 = vst.msk [vmem:[#allocation2 + $0x20] sm:$0xff] %vm35_vm0, %v3093_v15  ;;  %41 = vst.msk [vmem:[#allocation2 + $0x28] sm:$0xff] %vm35_vm0, %v3093_v15 }
  0x34   :  { %1205 = vmatpush1.bf16.msra.mxu0 %v2857_v17  ;;  %1494 = vmatpush1.bf16.msra.mxu1 %v2858_v18  ;;  %42 = vst.msk [vmem:[#allocation2 + $0x30] sm:$0xff] %vm35_vm0, %v3093_v15  ;;  %43 = vst.msk [vmem:[#allocation2 + $0x38] sm:$0xff] %vm35_vm0, %v3093_v15  ;;  %v2944_v17 = vld [vmem:[#allocation3 + $0x168] ss:$16 sps:$4 sm:$0xff]   ;;  %v2945_v18 = vld [vmem:[#allocation3 + $0x184] ss:$16 sps:$4 sm:$0xff]  }
  0x35   :  { %1206 = vmatprep.subr.bf16.mxu0 %v3092_v0  ;;  %1495 = vmatprep.subr.bf16.mxu1 %v3092_v0  ;;  %44 = vst.msk [vmem:[#allocation2 + $0x40] sm:$0xff] %vm35_vm0, %v3093_v15  ;;  %45 = vst.msk [vmem:[#allocation2 + $0x48] sm:$0xff] %vm35_vm0, %v3093_v15 }
  0x36   :  { %46 = vst.msk [vmem:[#allocation2 + $0x50] sm:$0xff] %vm35_vm0, %v3093_v15  ;;  %47 = vst.msk [vmem:[#allocation2 + $0x58] sm:$0xff] %vm35_vm0, %v3093_v15 }
  0x37   :  { %48 = vst.msk [vmem:[#allocation2 + $0x60] sm:$0xff] %vm35_vm0, %v3093_v15  ;;  %49 = vst.msk [vmem:[#allocation2 + $0x68] sm:$0xff] %vm35_vm0, %v3093_v15 }
  0x38   :  { %1207 = vmatpush1.bf16.msra.mxu0 %v2859_v20  ;;  %1496 = vmatpush1.bf16.msra.mxu1 %v2860_v22  ;;  %50 = vst.msk [vmem:[#allocation2 + $0x70] sm:$0xff] %vm35_vm0, %v3093_v15  ;;  %51 = vst.msk [vmem:[#allocation2 + $0x78] sm:$0xff] %vm35_vm0, %v3093_v15  ;;  %v2949_v20 = vld [vmem:[#allocation3 + $0x180] ss:$16 sps:$4 sm:$0xff]   ;;  %v2951_v22 = vld [vmem:[#allocation3 + $0x1a4] ss:$16 sps:$4 sm:$0xff]  }
  0x39   :  { %1208 = vmatprep.subr.bf16.mxu0 %v3092_v0  ;;  %1497 = vmatprep.subr.bf16.mxu1 %v3092_v0  ;;  %52 = vst.msk [vmem:[#allocation2 + $0x80] sm:$0xff] %vm35_vm0, %v3093_v15  ;;  %53 = vst.msk [vmem:[#allocation2 + $0x88] sm:$0xff] %vm35_vm0, %v3093_v15 }
  0x3a   :  { %54 = vst.msk [vmem:[#allocation2 + $0x90] sm:$0xff] %vm35_vm0, %v3093_v15  ;;  %55 = vst.msk [vmem:[#allocation2 + $0x98] sm:$0xff] %vm35_vm0, %v3093_v15 }
  0x3b   :  { %56 = vst.msk [vmem:[#allocation2 + $0xa0] sm:$0xff] %vm35_vm0, %v3093_v15  ;;  %57 = vst.msk [vmem:[#allocation2 + $0xa8] sm:$0xff] %vm35_vm0, %v3093_v15 }
  0x3c   :  { %1209 = vmatpush1.bf16.msra.mxu0 %v2861_v23  ;;  %1498 = vmatpush1.bf16.msra.mxu1 %v2862_v24  ;;  %58 = vst.msk [vmem:[#allocation2 + $0xb0] sm:$0xff] %vm35_vm0, %v3093_v15  ;;  %59 = vst.msk [vmem:[#allocation2 + $0xb8] sm:$0xff] %vm35_vm0, %v3093_v15  ;;  %v2953_v23 = vld [vmem:[#allocation3 + $0x1ac] ss:$16 sps:$4 sm:$0xff]   ;;  %v2955_v24 = vld [vmem:[#allocation3 + $0x1a0] ss:$16 sps:$4 sm:$0xff]  }
  0x3d   :  { %1210 = vmatprep.subr.bf16.mxu0 %v3092_v0  ;;  %1499 = vmatprep.subr.bf16.mxu1 %v3092_v0  ;;  %60 = vst.msk [vmem:[#allocation2 + $0xc0] sm:$0xff] %vm35_vm0, %v3093_v15  ;;  %61 = vst.msk [vmem:[#allocation2 + $0xc8] sm:$0xff] %vm35_vm0, %v3093_v15 }
  0x3e   :  { %62 = vst.msk [vmem:[#allocation2 + $0xd0] sm:$0xff] %vm35_vm0, %v3093_v15  ;;  %63 = vst.msk [vmem:[#allocation2 + $0xd8] sm:$0xff] %vm35_vm0, %v3093_v15 }
  0x3f   :  { %64 = vst.msk [vmem:[#allocation2 + $0xe0] sm:$0xff] %vm35_vm0, %v3093_v15  ;;  %65 = vst.msk [vmem:[#allocation2 + $0xe8] sm:$0xff] %vm35_vm0, %v3093_v15 }
  0x40   :  { %1211 = vmatpush1.bf16.msra.mxu0 %v2863_v25  ;;  %1500 = vmatpush1.bf16.msra.mxu1 %v2864_v26  ;;  %66 = vst.msk [vmem:[#allocation2 + $0xf0] sm:$0xff] %vm35_vm0, %v3093_v15  ;;  %67 = vst.msk [vmem:[#allocation2 + $0xf8] sm:$0xff] %vm35_vm0, %v3093_v15  ;;  %v2956_v25 = vld [vmem:[#allocation3 + $0x1a8] ss:$16 sps:$4 sm:$0xff]   ;;  %v2957_v26 = vld [vmem:[#allocation3 + $0x1c4] ss:$16 sps:$4 sm:$0xff]  }
  0x41   :  { %1212 = vmatprep.subr.bf16.mxu0 %v3092_v0  ;;  %1501 = vmatprep.subr.bf16.mxu1 %v3092_v0  ;;  %68 = vst.msk [vmem:[#allocation2 + $0x100] sm:$0xff] %vm35_vm0, %v3093_v15  ;;  %69 = vst.msk [vmem:[#allocation2 + $0x108] sm:$0xff] %vm35_vm0, %v3093_v15 }
  0x42   :  { %70 = vst.msk [vmem:[#allocation2 + $0x110] sm:$0xff] %vm35_vm0, %v3093_v15  ;;  %71 = vst.msk [vmem:[#allocation2 + $0x118] sm:$0xff] %vm35_vm0, %v3093_v15 }
  0x43   :  { %72 = vst.msk [vmem:[#allocation2 + $0x120] sm:$0xff] %vm35_vm0, %v3093_v15  ;;  %73 = vst.msk [vmem:[#allocation2 + $0x128] sm:$0xff] %vm35_vm0, %v3093_v15 }
  0x44   :  { %1213 = vmatpush1.bf16.msra.mxu0 %v2865_v27  ;;  %1502 = vmatpush1.bf16.msra.mxu1 %v2866_v28  ;;  %74 = vst.msk [vmem:[#allocation2 + $0x130] sm:$0xff] %vm35_vm0, %v3093_v15  ;;  %75 = vst.msk [vmem:[#allocation2 + $0x138] sm:$0xff] %vm35_vm0, %v3093_v15  ;;  %v2959_v27 = vld [vmem:[#allocation3 + $0x1cc] ss:$16 sps:$4 sm:$0xff]   ;;  %v2961_v28 = vld [vmem:[#allocation3 + $0x1c0] ss:$16 sps:$4 sm:$0xff]  }
  0x45   :  { %1214 = vmatprep.subr.bf16.mxu0 %v3092_v0  ;;  %1503 = vmatprep.subr.bf16.mxu1 %v3092_v0  ;;  %76 = vst.msk [vmem:[#allocation2 + $0x140] sm:$0xff] %vm35_vm0, %v3093_v15  ;;  %77 = vst.msk [vmem:[#allocation2 + $0x148] sm:$0xff] %vm35_vm0, %v3093_v15 }
  0x46   :  { %78 = vst.msk [vmem:[#allocation2 + $0x150] sm:$0xff] %vm35_vm0, %v3093_v15  ;;  %79 = vst.msk [vmem:[#allocation2 + $0x158] sm:$0xff] %vm35_vm0, %v3093_v15 }
  0x47   :  { %80 = vst.msk [vmem:[#allocation2 + $0x160] sm:$0xff] %vm35_vm0, %v3093_v15  ;;  %81 = vst.msk [vmem:[#allocation2 + $0x168] sm:$0xff] %vm35_vm0, %v3093_v15 }
  0x48   :  { %1215 = vmatpush1.bf16.msra.mxu0 %v2867_v29  ;;  %1504 = vmatpush1.bf16.msra.mxu1 %v2868_v30  ;;  %82 = vst.msk [vmem:[#allocation2 + $0x170] sm:$0xff] %vm35_vm0, %v3093_v15  ;;  %83 = vst.msk [vmem:[#allocation2 + $0x178] sm:$0xff] %vm35_vm0, %v3093_v15  ;;  %v2962_v29 = vld [vmem:[#allocation3 + $0x1c8] ss:$16 sps:$4 sm:$0xff]   ;;  %v2963_v30 = vld [vmem:[#allocation3 + $0x1e4] ss:$16 sps:$4 sm:$0xff]  }
  0x49   :  { %1216 = vmatprep.subr.bf16.mxu0 %v3092_v0  ;;  %1505 = vmatprep.subr.bf16.mxu1 %v3092_v0  ;;  %84 = vst.msk [vmem:[#allocation2 + $0x180] sm:$0xff] %vm35_vm0, %v3093_v15  ;;  %85 = vst.msk [vmem:[#allocation2 + $0x188] sm:$0xff] %vm35_vm0, %v3093_v15 }
  0x4a   :  { %86 = vst.msk [vmem:[#allocation2 + $0x190] sm:$0xff] %vm35_vm0, %v3093_v15  ;;  %87 = vst.msk [vmem:[#allocation2 + $0x198] sm:$0xff] %vm35_vm0, %v3093_v15 }
  0x4b   :  { %88 = vst.msk [vmem:[#allocation2 + $0x1a0] sm:$0xff] %vm35_vm0, %v3093_v15  ;;  %89 = vst.msk [vmem:[#allocation2 + $0x1a8] sm:$0xff] %vm35_vm0, %v3093_v15 }
  0x4c   :  { %1217 = vmatpush1.bf16.msra.mxu0 %v2869_v31  ;;  %1506 = vmatpush1.bf16.msra.mxu1 %v2870_v32  ;;  %90 = vst.msk [vmem:[#allocation2 + $0x1b0] sm:$0xff] %vm35_vm0, %v3093_v15  ;;  %91 = vst.msk [vmem:[#allocation2 + $0x1b8] sm:$0xff] %vm35_vm0, %v3093_v15  ;;  %v2965_v31 = vld [vmem:[#allocation3 + $0x1ec] ss:$16 sps:$4 sm:$0xff]   ;;  %v2967_v32 = vld [vmem:[#allocation3 + $0x1e0] ss:$16 sps:$4 sm:$0xff]  }
  0x4d   :  { %1218 = vmatprep.subr.bf16.mxu0 %v3092_v0  ;;  %1507 = vmatprep.subr.bf16.mxu1 %v3092_v0  ;;  %v2920_v0 = vld [vmem:[#allocation3 + $0xe8] ss:$16 sps:$4 sm:$0xff]   ;;  %92 = vst.msk [vmem:[#allocation2 + $0x1c0] sm:$0xff] %vm35_vm0, %v3093_v15  ;;  %93 = vst.msk [vmem:[#allocation2 + $0x1c8] sm:$0xff] %vm35_vm0, %v3093_v15 }
  0x4e   :  { %94 = vst.msk [vmem:[#allocation2 + $0x1d0] sm:$0xff] %vm35_vm0, %v3093_v15  ;;  %95 = vst.msk [vmem:[#allocation2 + $0x1d8] sm:$0xff] %vm35_vm0, %v3093_v15 }
  0x4f   :  { %96 = vst.msk [vmem:[#allocation2 + $0x1e0] sm:$0xff] %vm35_vm0, %v3093_v15  ;;  %97 = vst.msk [vmem:[#allocation2 + $0x1e8] sm:$0xff] %vm35_vm0, %v3093_v15 }
  0x50   :  { %1219 = vmatpush1.bf16.msra.mxu0 %v2871_v33  ;;  %1508 = vmatpush1.bf16.msra.mxu1 %v2872_v34  ;;  %98 = vst.msk [vmem:[#allocation2 + $0x1f0] sm:$0xff] %vm35_vm0, %v3093_v15  ;;  %99 = vst.msk [vmem:[#allocation2 + $0x1f8] sm:$0xff] %vm35_vm0, %v3093_v15  ;;  %v2968_v33 = vld [vmem:[#allocation3 + $0x1e8] ss:$16 sps:$4 sm:$0xff]   ;;  %v2969_v34 = vld [vmem:[#allocation3 + $0x204] ss:$16 sps:$4 sm:$0xff]  }
  0x51   :  { %v3037_v15 = vld [vmem:[#allocation3 + $0x36c] ss:$16 sps:$4 sm:$0xff]  }
  0x53   :  { %1221 = vmatmul.mubr.bf16.vlgmr.msra.gmra.mrb[0].mxu0 %v2873_v35  ;;  %1510 = vmatmul.mubr.bf16.vlgmr.msra.gmra.mrb[0].mxu1 %v2876_v36  ;;  %v2971_v35 = vld [vmem:[#allocation3 + $0x20c] ss:$16 sps:$4 sm:$0xff]   ;;  %v2973_v36 = vld [vmem:[#allocation3 + $0x200] ss:$16 sps:$4 sm:$0xff]  }
  0x54   :  { %1228 = vmatprep.mubr.bf16.mxu0 %v2879_v37  ;;  %1517 = vmatprep.mubr.bf16.mxu1 %v2881_v38  ;;  %v2974_v37 = vld [vmem:[#allocation3 + $0x208] ss:$16 sps:$4 sm:$0xff]   ;;  %v2975_v38 = vld [vmem:[#allocation3 + $0x224] ss:$16 sps:$4 sm:$0xff]  }
  0x5b   :  { %1229 = vmatmul.mubr.bf16.gmra.mrb[4].mxu0 %v2883_v39  ;;  %1518 = vmatmul.mubr.bf16.gmra.mrb[4].mxu1 %v2884_v40  ;;  %v2977_v39 = vld [vmem:[#allocation3 + $0x22c] ss:$16 sps:$4 sm:$0xff]   ;;  %v2979_v40 = vld [vmem:[#allocation3 + $0x220] ss:$16 sps:$4 sm:$0xff]  }
  0x5c   :  { %1236 = vmatprep.mubr.bf16.mxu0 %v2885_v41  ;;  %1525 = vmatprep.mubr.bf16.mxu1 %v2887_v42  ;;  %v2980_v41 = vld [vmem:[#allocation3 + $0x228] ss:$16 sps:$4 sm:$0xff]   ;;  %v2981_v42 = vld [vmem:[#allocation3 + $0x244] ss:$16 sps:$4 sm:$0xff]  }
  0x63   :  { %1237 = vmatmul.mubr.bf16.gmra.mrb[8].mxu0 %v2889_v43  ;;  %1526 = vmatmul.mubr.bf16.gmra.mrb[8].mxu1 %v2890_v44  ;;  %v2983_v43 = vld [vmem:[#allocation3 + $0x24c] ss:$16 sps:$4 sm:$0xff]   ;;  %v2985_v44 = vld [vmem:[#allocation3 + $0x240] ss:$16 sps:$4 sm:$0xff]  }
  0x64   :  { %1244 = vmatprep.mubr.bf16.mxu0 %v2891_v45  ;;  %1533 = vmatprep.mubr.bf16.mxu1 %v2893_v46  ;;  %v2986_v45 = vld [vmem:[#allocation3 + $0x248] ss:$16 sps:$4 sm:$0xff]   ;;  %v2987_v46 = vld [vmem:[#allocation3 + $0x264] ss:$16 sps:$4 sm:$0xff]  }
  0x6b   :  { %1245 = vmatmul.mubr.bf16.gmra.mrb[12].mxu0 %v2895_v47  ;;  %1534 = vmatmul.mubr.bf16.gmra.mrb[12].mxu1 %v2896_v48  ;;  %v2989_v47 = vld [vmem:[#allocation3 + $0x26c] ss:$16 sps:$4 sm:$0xff]   ;;  %v2991_v48 = vld [vmem:[#allocation3 + $0x260] ss:$16 sps:$4 sm:$0xff]  }
  0x6c   :  { %1252 = vmatprep.mubr.bf16.mxu0 %v2897_v49  ;;  %1541 = vmatprep.mubr.bf16.mxu1 %v2899_v50  ;;  %v2992_v49 = vld [vmem:[#allocation3 + $0x268] ss:$16 sps:$4 sm:$0xff]   ;;  %v2993_v50 = vld [vmem:[#allocation3 + $0x284] ss:$16 sps:$4 sm:$0xff]  }
  0x73   :  { %1253 = vmatmul.mubr.bf16.gmra.mrb[16].mxu0 %v2901_v51  ;;  %1542 = vmatmul.mubr.bf16.gmra.mrb[16].mxu1 %v2902_v52  ;;  %v2995_v51 = vld [vmem:[#allocation3 + $0x28c] ss:$16 sps:$4 sm:$0xff]   ;;  %v2997_v52 = vld [vmem:[#allocation3 + $0x280] ss:$16 sps:$4 sm:$0xff]  }
  0x74   :  { %1260 = vmatprep.mubr.bf16.mxu0 %v2903_v53  ;;  %1549 = vmatprep.mubr.bf16.mxu1 %v2905_v54  ;;  %v2998_v53 = vld [vmem:[#allocation3 + $0x288] ss:$16 sps:$4 sm:$0xff]   ;;  %v2999_v54 = vld [vmem:[#allocation3 + $0x2a4] ss:$16 sps:$4 sm:$0xff]  }
  0x7b   :  { %1261 = vmatmul.mubr.bf16.gmra.mrb[20].mxu0 %v2907_v55  ;;  %1550 = vmatmul.mubr.bf16.gmra.mrb[20].mxu1 %v2908_v56  ;;  %v3001_v55 = vld [vmem:[#allocation3 + $0x2ac] ss:$16 sps:$4 sm:$0xff]   ;;  %v3003_v56 = vld [vmem:[#allocation3 + $0x2a0] ss:$16 sps:$4 sm:$0xff]  }
  0x7c   :  { %1268 = vmatprep.mubr.bf16.mxu0 %v2909_v57  ;;  %1557 = vmatprep.mubr.bf16.mxu1 %v2911_v58  ;;  %v3004_v57 = vld [vmem:[#allocation3 + $0x2a8] ss:$16 sps:$4 sm:$0xff]   ;;  %v3005_v58 = vld [vmem:[#allocation3 + $0x2c4] ss:$16 sps:$4 sm:$0xff]  }
  0x83   :  { %1269 = vmatmul.mubr.bf16.gmra.mrb[24].mxu0 %v2913_v59  ;;  %1558 = vmatmul.mubr.bf16.gmra.mrb[24].mxu1 %v2914_v60  ;;  %v3007_v59 = vld [vmem:[#allocation3 + $0x2cc] ss:$16 sps:$4 sm:$0xff]   ;;  %v3009_v60 = vld [vmem:[#allocation3 + $0x2c0] ss:$16 sps:$4 sm:$0xff]  }
  0x84   :  { %1276 = vmatprep.mubr.bf16.mxu0 %v2915_v61  ;;  %1565 = vmatprep.mubr.bf16.mxu1 %v2917_v62  ;;  %v3010_v61 = vld [vmem:[#allocation3 + $0x2c8] ss:$16 sps:$4 sm:$0xff]   ;;  %v3011_v62 = vld [vmem:[#allocation3 + $0x2e4] ss:$16 sps:$4 sm:$0xff]  }
  0x8b   :  { %1277 = vmatmul.mubr.bf16.gmra.mrb[28].mxu0 %v2919_v63  ;;  %1566 = vmatmul.mubr.bf16.gmra.mrb[28].mxu1 %v2920_v0  ;;  %v3013_v63 = vld [vmem:[#allocation3 + $0x2ec] ss:$16 sps:$4 sm:$0xff]   ;;  %v3015_v0 = vld [vmem:[#allocation3 + $0x2e0] ss:$16 sps:$4 sm:$0xff]  }
  0x8c   :  { %1284 = vmatprep.mubr.bf16.mxu0 %v2921_v1  ;;  %1573 = vmatprep.mubr.bf16.mxu1 %v2923_v2  ;;  %v3016_v1 = vld [vmem:[#allocation3 + $0x2e8] ss:$16 sps:$4 sm:$0xff]   ;;  %v3017_v2 = vld [vmem:[#allocation3 + $0x304] ss:$16 sps:$4 sm:$0xff]  }
  0x93   :  { %1285 = vmatmul.mubr.bf16.gmra.mrb[32].mxu0 %v2925_v3  ;;  %1574 = vmatmul.mubr.bf16.gmra.mrb[32].mxu1 %v2926_v4  ;;  %v3019_v3 = vld [vmem:[#allocation3 + $0x30c] ss:$16 sps:$4 sm:$0xff]   ;;  %v3021_v4 = vld [vmem:[#allocation3 + $0x300] ss:$16 sps:$4 sm:$0xff]  }
  0x94   :  { %1292 = vmatprep.mubr.bf16.mxu0 %v2927_v5  ;;  %1581 = vmatprep.mubr.bf16.mxu1 %v2929_v6  ;;  %v3022_v5 = vld [vmem:[#allocation3 + $0x308] ss:$16 sps:$4 sm:$0xff]   ;;  %v3023_v6 = vld [vmem:[#allocation3 + $0x324] ss:$16 sps:$4 sm:$0xff]  }
  0x9b   :  { %1293 = vmatmul.mubr.bf16.gmra.mrb[36].mxu0 %v2931_v7  ;;  %1582 = vmatmul.mubr.bf16.gmra.mrb[36].mxu1 %v2932_v8  ;;  %v3025_v7 = vld [vmem:[#allocation3 + $0x32c] ss:$16 sps:$4 sm:$0xff]   ;;  %v3027_v8 = vld [vmem:[#allocation3 + $0x320] ss:$16 sps:$4 sm:$0xff]  }
  0x9c   :  { %1300 = vmatprep.mubr.bf16.mxu0 %v2933_v9  ;;  %1589 = vmatprep.mubr.bf16.mxu1 %v2935_v10  ;;  %v3028_v9 = vld [vmem:[#allocation3 + $0x328] ss:$16 sps:$4 sm:$0xff]   ;;  %v3029_v10 = vld [vmem:[#allocation3 + $0x344] ss:$16 sps:$4 sm:$0xff]  }
  0xa3   :  { %1301 = vmatmul.mubr.bf16.gmra.mrb[40].mxu0 %v3259_v11  ;;  %1590 = vmatmul.mubr.bf16.gmra.mrb[40].mxu1 %v3261_v12  ;;  %v3031_v11 = vld [vmem:[#allocation3 + $0x34c] ss:$16 sps:$4 sm:$0xff]   ;;  %v3033_v12 = vld [vmem:[#allocation3 + $0x340] ss:$16 sps:$4 sm:$0xff]  }
  0xa4   :  { %1308 = vmatprep.mubr.bf16.mxu0 %v3263_v13  ;;  %1597 = vmatprep.mubr.bf16.mxu1 %v3265_v14  ;;  %v3034_v13 = vld [vmem:[#allocation3 + $0x348] ss:$16 sps:$4 sm:$0xff]   ;;  %v3035_v14 = vld [vmem:[#allocation3 + $0x364] ss:$16 sps:$4 sm:$0xff]  }
  0xab   :  { %1309 = vmatmul.mubr.bf16.gmra.mrb[44].mxu0 %v2943_v16  ;;  %1598 = vmatmul.mubr.bf16.gmra.mrb[44].mxu1 %v2944_v17  ;;  %v100_v17 = vld [vmem:[#allocation2] sm:$0xff] }
  0xac   :  { %1316 = vmatprep.mubr.bf16.mxu0 %v2945_v18  ;;  %1605 = vmatprep.mubr.bf16.mxu1 %v2947_v19 }
  0xb3   :  { %1317 = vmatmul.mubr.bf16.gmra.mrb[48].mxu0 %v2949_v20  ;;  %1606 = vmatmul.mubr.bf16.gmra.mrb[48].mxu1 %v2950_v21  ;;  %v3039_v20 = vld [vmem:[#allocation3 + $0x360] ss:$16 sps:$4 sm:$0xff]  }
  0xb4   :  { %1324 = vmatprep.mubr.bf16.mxu0 %v2951_v22  ;;  %1613 = vmatprep.mubr.bf16.mxu1 %v2953_v23 }
  0xbb   :  { %1325 = vmatmul.mubr.bf16.gmra.mrb[52].mxu0 %v2955_v24  ;;  %1614 = vmatmul.mubr.bf16.gmra.mrb[52].mxu1 %v2956_v25  ;;  %v3040_v24 = vld [vmem:[#allocation3 + $0x368] ss:$16 sps:$4 sm:$0xff]   ;;  %v3041_v25 = vld [vmem:[#allocation3 + $0x384] ss:$16 sps:$4 sm:$0xff]  }
  0xbc   :  { %1332 = vmatprep.mubr.bf16.mxu0 %v2957_v26  ;;  %1621 = vmatprep.mubr.bf16.mxu1 %v2959_v27  ;;  %v101_v26 = vld [vmem:[#allocation2 + $0x8] sm:$0xff] }
  0xc3   :  { %1333 = vmatmul.mubr.bf16.gmra.mrb[56].mxu0 %v2961_v28  ;;  %1622 = vmatmul.mubr.bf16.gmra.mrb[56].mxu1 %v2962_v29  ;;  %v3043_v29 = vld [vmem:[#allocation3 + $0x38c] ss:$16 sps:$4 sm:$0xff]  }
  0xc4   :  { %1340 = vmatprep.mubr.bf16.mxu0 %v2963_v30  ;;  %1629 = vmatprep.mubr.bf16.mxu1 %v2965_v31 }
  0xcb   :  { %1341 = vmatmul.mubr.bf16.gmra.mrb[60].mxu0 %v2967_v32  ;;  %1630 = vmatmul.mubr.bf16.gmra.mrb[60].mxu1 %v2968_v33 }
  0xcc   :  { %1348 = vmatprep.mubr.bf16.mxu0 %v2969_v34  ;;  %1637 = vmatprep.mubr.bf16.mxu1 %v2971_v35  ;;  %v102_v35 = vld [vmem:[#allocation2 + $0x10] sm:$0xff] }
  0xd3   :  { %1349 = vmatmul.mubr.bf16.gmra.mrb[64].mxu0 %v2973_v36  ;;  %1638 = vmatmul.mubr.bf16.gmra.mrb[64].mxu1 %v2974_v37 }
  0xd4   :  { %1356 = vmatprep.mubr.bf16.mxu0 %v2975_v38  ;;  %1645 = vmatprep.mubr.bf16.mxu1 %v2977_v39  ;;  %v3045_v38 = vld [vmem:[#allocation3 + $0x380] ss:$16 sps:$4 sm:$0xff]  }
  0xdb   :  { %1357 = vmatmul.mubr.bf16.gmra.mrb[68].mxu0 %v2979_v40  ;;  %1646 = vmatmul.mubr.bf16.gmra.mrb[68].mxu1 %v2980_v41 }
  0xdc   :  { %1364 = vmatprep.mubr.bf16.mxu0 %v2981_v42  ;;  %1653 = vmatprep.mubr.bf16.mxu1 %v2983_v43  ;;  %v3046_v42 = vld [vmem:[#allocation3 + $0x388] ss:$16 sps:$4 sm:$0xff]   ;;  %v3047_v43 = vld [vmem:[#allocation3 + $0x3a4] ss:$16 sps:$4 sm:$0xff]  }
  0xe3   :  { %1365 = vmatmul.mubr.bf16.gmra.mrb[72].mxu0 %v2985_v44  ;;  %1654 = vmatmul.mubr.bf16.gmra.mrb[72].mxu1 %v2986_v45  ;;  %v2283_v44 = vld [vmem:[%s4169_s2] sm:$0xff]  ;;  %v103_v45 = vld [vmem:[#allocation2 + $0x18] sm:$0xff] }
  0xe4   :  { %1372 = vmatprep.mubr.bf16.mxu0 %v2987_v46  ;;  %1661 = vmatprep.mubr.bf16.mxu1 %v2989_v47 }
  0xeb   :  { %1373 = vmatmul.mubr.bf16.gmra.mrb[76].mxu0 %v2991_v48  ;;  %1662 = vmatmul.mubr.bf16.gmra.mrb[76].mxu1 %v2992_v49  ;;  %v3049_v48 = vld [vmem:[#allocation3 + $0x3ac] ss:$16 sps:$4 sm:$0xff]  }
  0xec   :  { %1380 = vmatprep.mubr.bf16.mxu0 %v2993_v50  ;;  %1669 = vmatprep.mubr.bf16.mxu1 %v2995_v51 }
  0xf3   :  { %1381 = vmatmul.mubr.bf16.gmra.mrb[80].mxu0 %v2997_v52  ;;  %1670 = vmatmul.mubr.bf16.gmra.mrb[80].mxu1 %v2998_v53  ;;  %v2284_v53 = vld [vmem:[%s4169_s2 + $0x8] sm:$0xff] }
  0xf4   :  { %1388 = vmatprep.mubr.bf16.mxu0 %v2999_v54  ;;  %1677 = vmatprep.mubr.bf16.mxu1 %v3001_v55 }
  0xfb   :  { %1389 = vmatmul.mubr.bf16.gmra.mrb[84].mxu0 %v3003_v56  ;;  %1678 = vmatmul.mubr.bf16.gmra.mrb[84].mxu1 %v3004_v57 }
  0xfc   :  { %1396 = vmatprep.mubr.bf16.mxu0 %v3005_v58  ;;  %1685 = vmatprep.mubr.bf16.mxu1 %v3007_v59 }
 0x103   :  { %1397 = vmatmul.mubr.bf16.gmra.mrb[88].mxu0 %v3009_v60  ;;  %1686 = vmatmul.mubr.bf16.gmra.mrb[88].mxu1 %v3010_v61  ;;  %v104_v61 = vld [vmem:[#allocation2 + $0x20] sm:$0xff] }
 0x104   :  { %1404 = vmatprep.mubr.bf16.mxu0 %v3011_v62  ;;  %1693 = vmatprep.mubr.bf16.mxu1 %v3013_v63 }
 0x10b   :  { %1405 = vmatmul.mubr.bf16.gmra.mrb[92].mxu0 %v3015_v0  ;;  %1694 = vmatmul.mubr.bf16.gmra.mrb[92].mxu1 %v3016_v1  ;;  %v3051_v0 = vld [vmem:[#allocation3 + $0x3a0] ss:$16 sps:$4 sm:$0xff]  }
 0x10c   :  { %1412 = vmatprep.mubr.bf16.mxu0 %v3017_v2  ;;  %1701 = vmatprep.mubr.bf16.mxu1 %v3019_v3 }
 0x113   :  { %1413 = vmatmul.mubr.bf16.gmra.mrb[96].mxu0 %v3021_v4  ;;  %1702 = vmatmul.mubr.bf16.gmra.mrb[96].mxu1 %v3022_v5  ;;  %v3052_v4 = vld [vmem:[#allocation3 + $0x3a8] ss:$16 sps:$4 sm:$0xff]   ;;  %v3053_v5 = vld [vmem:[#allocation3 + $0x3c4] ss:$16 sps:$4 sm:$0xff]  }
 0x114   :  { %1420 = vmatprep.mubr.bf16.mxu0 %v3023_v6  ;;  %1709 = vmatprep.mubr.bf16.mxu1 %v3025_v7  ;;  %v2285_v6 = vld [vmem:[%s4169_s2 + $0x10] sm:$0xff]  ;;  %v105_v7 = vld [vmem:[#allocation2 + $0x28] sm:$0xff] }
 0x11b   :  { %1421 = vmatmul.mubr.bf16.gmra.mrb[100].mxu0 %v3027_v8  ;;  %1710 = vmatmul.mubr.bf16.gmra.mrb[100].mxu1 %v3028_v9 }
 0x11c   :  { %1428 = vmatprep.mubr.bf16.mxu0 %v3029_v10  ;;  %1717 = vmatprep.mubr.bf16.mxu1 %v3031_v11  ;;  %v3055_v10 = vld [vmem:[#allocation3 + $0x3cc] ss:$16 sps:$4 sm:$0xff]  }
 0x123   :  { %1429 = vmatmul.mubr.bf16.gmra.mrb[104].mxu0 %v3033_v12  ;;  %1718 = vmatmul.mubr.bf16.gmra.mrb[104].mxu1 %v3034_v13 }
 0x124   :  { %1436 = vmatprep.mubr.bf16.mxu0 %v3035_v14  ;;  %1725 = vmatprep.mubr.bf16.mxu1 %v3037_v15  ;;  %v2286_v15 = vld [vmem:[%s4169_s2 + $0x18] sm:$0xff] }
 0x126   :  { %v1222_v16 = vpop.f32.mrb[0].mxu0  ;;  %v1511_v18 = vpop.f32.mrb[0].mxu1 }
 0x127   :  { %v1224_v19 = vpop.f32.mrb[1].mxu0  ;;  %v1512_v21 = vadd.f32 %v1511_v18, %v1222_v16  ;;  %v1513_v22 = vpop.f32.mrb[1].mxu1 }
 0x128   :  { %v1225_v23 = vpop.f32.mrb[2].mxu0  ;;  %v1514_v27 = vpop.f32.mrb[2].mxu1 }
 0x129   :  { %v1227_v28 = vpop.f32.mrb[3].mxu0  ;;  %v1766_v30 = vadd.f32 %v1512_v21, %v100_v17  ;;  %v1515_v31 = vadd.f32 %v1514_v27, %v1225_v23  ;;  %v1516_v32 = vpop.f32.mrb[3].mxu1  ;;  %v106_v23 = vld [vmem:[#allocation2 + $0x30] sm:$0xff] }
 0x12a   :  { %v2287_v32 = vld [vmem:[%s4169_s2 + $0x20] sm:$0xff] }
 0x12b   :  { %1437 = vmatmul.mubr.bf16.gmra.mrb[108].mxu0 %v3039_v20  ;;  %1831 = vst.msk [vmem:[#allocation2] sm:$0xff] %vm35_vm0, %v1766_v30  ;;  %v1767_v33 = vadd.f32 %v1515_v31, %v101_v26  ;;  %1726 = vmatmul.mubr.bf16.gmra.mrb[108].mxu1 %v3040_v24  ;;  %v3057_v26 = vld [vmem:[#allocation3 + $0x3c0] ss:$16 sps:$4 sm:$0xff]   ;;  %v3058_v30 = vld [vmem:[#allocation3 + $0x3c8] ss:$16 sps:$4 sm:$0xff]  }
 0x12c   :  { %1444 = vmatprep.mubr.bf16.mxu0 %v3041_v25  ;;  %1733 = vmatprep.mubr.bf16.mxu1 %v3043_v29  ;;  %v3059_v31 = vld [vmem:[#allocation3 + $0x3e4] ss:$16 sps:$4 sm:$0xff]  }
 0x12d   :  { %1832 = vst.msk [vmem:[#allocation2 + $0x8] sm:$0xff] %vm35_vm0, %v1767_v33  ;;  %v107_v33 = vld [vmem:[#allocation2 + $0x38] sm:$0xff] }
 0x12e   :  { %v1230_v34 = vpop.f32.mrb[4].mxu0  ;;  %v1519_v36 = vpop.f32.mrb[4].mxu1 }
 0x12f   :  { %v1232_v37 = vpop.f32.mrb[5].mxu0  ;;  %v1520_v39 = vadd.f32 %v1519_v36, %v1230_v34  ;;  %v1521_v40 = vpop.f32.mrb[5].mxu1  ;;  %v3061_v36 = vld [vmem:[#allocation3 + $0x3ec] ss:$16 sps:$4 sm:$0xff]  }
 0x130   :  { %v1233_v41 = vpop.f32.mrb[6].mxu0  ;;  %v1522_v46 = vpop.f32.mrb[6].mxu1 }
 0x131   :  { %v1235_v47 = vpop.f32.mrb[7].mxu0  ;;  %v1768_v49 = vadd.f32 %v1520_v39, %v102_v35  ;;  %v1523_v50 = vadd.f32 %v1522_v46, %v1233_v41  ;;  %v1524_v51 = vpop.f32.mrb[7].mxu1  ;;  %v2288_v41 = vld [vmem:[%s4169_s2 + $0x28] sm:$0xff] }
 0x132   :  { %v1898_v52 = vld [vmem:[#allocation2] sm:$0xff] }
 0x133   :  { %1445 = vmatmul.mubr.bf16.gmra.mrb[112].mxu0 %v3045_v38  ;;  %v2772_v54 = vpack.c.bf16 %v1898_v52, %v1898_v52  ;;  %v2411_v55 = vadd.f32 %v2283_v44, %v1898_v52  ;;  %1833 = vst.msk [vmem:[#allocation2 + $0x10] sm:$0xff] %vm35_vm0, %v1768_v49  ;;  %v1769_v56 = vadd.f32 %v1523_v50, %v103_v45  ;;  %v108_v49 = vld [vmem:[#allocation2 + $0x40] sm:$0xff] }
 0x134   :  { %1734 = vmatmul.mubr.bf16.gmra.mrb[112].mxu1 %v3046_v42  ;;  %1452 = vmatprep.mubr.bf16.mxu0 %v3047_v43  ;;  %v1899_v57 = vld [vmem:[#allocation2 + $0x8] sm:$0xff]  ;;  %v3063_v52 = vld [vmem:[#allocation3 + $0x3e0] ss:$16 sps:$4 sm:$0xff]  }
 0x135   :  { %1741 = vmatprep.mubr.bf16.mxu1 %v3049_v48  ;;  %2219 = vst.msk [vmem:[%s4170_s3] sm:$0xf] %vm2218_vm1, %v2772_v54  ;;  %v2773_v58 = vpack.c.bf16 %v1899_v57, %v1899_v57  ;;  %v2412_v59 = vadd.f32 %v2284_v53, %v1899_v57  ;;  %v2289_v57 = vld [vmem:[%s4169_s2 + $0x30] sm:$0xff] }
 0x136   :  { %2475 = vst.msk [vmem:[%s4171_s4] sm:$0xff] %vm35_vm0, %v2411_v55  ;;  %1834 = vst.msk [vmem:[#allocation2 + $0x18] sm:$0xff] %vm35_vm0, %v1769_v56  ;;  %v1238_v60 = vpop.f32.mrb[8].mxu0  ;;  %v1527_v62 = vpop.f32.mrb[8].mxu1  ;;  %v3064_v56 = vld [vmem:[#allocation3 + $0x3e8] ss:$16 sps:$4 sm:$0xff]  }
 0x137   :  { %v1240_v63 = vpop.f32.mrb[9].mxu0  ;;  %2220 = vst.msk [vmem:[%s4170_s3 + $0x4] sm:$0xf] %vm2218_vm1, %v2773_v58  ;;  %v1528_v1 = vadd.f32 %v1527_v62, %v1238_v60  ;;  %v1529_v2 = vpop.f32.mrb[9].mxu1  ;;  %v109_v58 = vld [vmem:[#allocation2 + $0x48] sm:$0xff] }
 0x138   :  { %2476 = vst.msk [vmem:[%s4171_s4 + $0x8] sm:$0xff] %vm35_vm0, %v2412_v59  ;;  %v1241_v3 = vpop.f32.mrb[10].mxu0  ;;  %v1530_v8 = vpop.f32.mrb[10].mxu1 }
 0x139   :  { %v1243_v9 = vpop.f32.mrb[11].mxu0  ;;  %v1770_v11 = vadd.f32 %v1528_v1, %v104_v61  ;;  %v1531_v12 = vadd.f32 %v1530_v8, %v1241_v3  ;;  %v1532_v13 = vpop.f32.mrb[11].mxu1  ;;  %v2290_v1 = vld [vmem:[%s4169_s2 + $0x38] sm:$0xff] }
 0x13a   :  { %v1900_v14 = vld [vmem:[#allocation2 + $0x10] sm:$0xff] }
 0x13b   :  { %1453 = vmatmul.mubr.bf16.gmra.mrb[116].mxu0 %v3051_v0  ;;  %v2774_v16 = vpack.c.bf16 %v1900_v14, %v1900_v14  ;;  %v2413_v17 = vadd.f32 %v2285_v6, %v1900_v14  ;;  %1835 = vst.msk [vmem:[#allocation2 + $0x20] sm:$0xff] %vm35_vm0, %v1770_v11  ;;  %v1771_v18 = vadd.f32 %v1531_v12, %v105_v7  ;;  %v110_v9 = vld [vmem:[#allocation2 + $0x50] sm:$0xff] }
 0x13c   :  { %1742 = vmatmul.mubr.bf16.gmra.mrb[116].mxu1 %v3052_v4  ;;  %1460 = vmatprep.mubr.bf16.mxu0 %v3053_v5 }
 0x13d   :  { %v1901_v19 = vld [vmem:[#allocation2 + $0x18] sm:$0xff]  ;;  %1749 = vmatprep.mubr.bf16.mxu1 %v3055_v10  ;;  %2221 = vst.msk [vmem:[%s4170_s3 + $0x8] sm:$0xf] %vm2218_vm1, %v2774_v16 }
 0x13e   :  { %2477 = vst.msk [vmem:[%s4171_s4 + $0x10] sm:$0xff] %vm35_vm0, %v2413_v17  ;;  %v2775_v20 = vpack.c.bf16 %v1901_v19, %v1901_v19  ;;  %v2414_v21 = vadd.f32 %v2286_v15, %v1901_v19  ;;  %1836 = vst.msk [vmem:[#allocation2 + $0x28] sm:$0xff] %vm35_vm0, %v1771_v18  ;;  %v1246_v22 = vpop.f32.mrb[12].mxu0  ;;  %v1535_v24 = vpop.f32.mrb[12].mxu1  ;;  %v2291_v15 = vld [vmem:[%s4169_s2 + $0x40] sm:$0xff]  ;;  %v111_v16 = vld [vmem:[#allocation2 + $0x58] sm:$0xff] }
 0x13f   :  { %v1248_v25 = vpop.f32.mrb[13].mxu0  ;;  %v1536_v27 = vadd.f32 %v1535_v24, %v1246_v22  ;;  %v1537_v28 = vpop.f32.mrb[13].mxu1 }
 0x140   :  { %2222 = vst.msk [vmem:[%s4170_s3 + $0xc] sm:$0xf] %vm2218_vm1, %v2775_v20  ;;  %v1249_v29 = vpop.f32.mrb[14].mxu0  ;;  %v1538_v34 = vpop.f32.mrb[14].mxu1 }
 0x141   :  { %2478 = vst.msk [vmem:[%s4171_s4 + $0x18] sm:$0xff] %vm35_vm0, %v2414_v21  ;;  %v1251_v35 = vpop.f32.mrb[15].mxu0  ;;  %v1772_v37 = vadd.f32 %v1536_v27, %v106_v23  ;;  %v1539_v38 = vadd.f32 %v1538_v34, %v1249_v29  ;;  %v1540_v39 = vpop.f32.mrb[15].mxu1  ;;  %v2292_v23 = vld [vmem:[%s4169_s2 + $0x48] sm:$0xff] }
 0x142   :  { %v1902_v40 = vld [vmem:[#allocation2 + $0x20] sm:$0xff] }
 0x143   :  { %1461 = vmatmul.mubr.bf16.gmra.mrb[120].mxu0 %v3057_v26  ;;  %v2776_v42 = vpack.c.bf16 %v1902_v40, %v1902_v40  ;;  %v2415_v43 = vadd.f32 %v2287_v32, %v1902_v40  ;;  %1837 = vst.msk [vmem:[#allocation2 + $0x30] sm:$0xff] %vm35_vm0, %v1772_v37  ;;  %v1773_v44 = vadd.f32 %v1539_v38, %v107_v33  ;;  %v2293_v37 = vld [vmem:[%s4169_s2 + $0x50] sm:$0xff]  ;;  %v113_v38 = vld [vmem:[#allocation2 + $0x68] sm:$0xff] }
 0x144   :  { %1750 = vmatmul.mubr.bf16.gmra.mrb[120].mxu1 %v3058_v30  ;;  %1468 = vmatprep.mubr.bf16.mxu0 %v3059_v31  ;;  %v112_v31 = vld [vmem:[#allocation2 + $0x60] sm:$0xff] }
 0x145   :  { %v1903_v45 = vld [vmem:[#allocation2 + $0x28] sm:$0xff]  ;;  %1757 = vmatprep.mubr.bf16.mxu1 %v3061_v36  ;;  %2223 = vst.msk [vmem:[%s4170_s3 + $0x10] sm:$0xf] %vm2218_vm1, %v2776_v42 }
 0x146   :  { %2479 = vst.msk [vmem:[%s4171_s4 + $0x20] sm:$0xff] %vm35_vm0, %v2415_v43  ;;  %v2777_v46 = vpack.c.bf16 %v1903_v45, %v1903_v45  ;;  %v2416_v47 = vadd.f32 %v2288_v41, %v1903_v45  ;;  %1838 = vst.msk [vmem:[#allocation2 + $0x38] sm:$0xff] %vm35_vm0, %v1773_v44  ;;  %v1254_v48 = vpop.f32.mrb[16].mxu0  ;;  %v1543_v50 = vpop.f32.mrb[16].mxu1  ;;  %v2294_v45 = vld [vmem:[%s4169_s2 + $0x58] sm:$0xff] }
 0x147   :  { %v1256_v51 = vpop.f32.mrb[17].mxu0  ;;  %v1544_v53 = vadd.f32 %v1543_v50, %v1254_v48  ;;  %v1545_v54 = vpop.f32.mrb[17].mxu1 }
 0x148   :  { %2224 = vst.msk [vmem:[%s4170_s3 + $0x14] sm:$0xf] %vm2218_vm1, %v2777_v46  ;;  %v1257_v55 = vpop.f32.mrb[18].mxu0  ;;  %v1546_v59 = vpop.f32.mrb[18].mxu1 }
 0x149   :  { %2480 = vst.msk [vmem:[%s4171_s4 + $0x28] sm:$0xff] %vm35_vm0, %v2416_v47  ;;  %v1259_v60 = vpop.f32.mrb[19].mxu0  ;;  %v1774_v61 = vadd.f32 %v1544_v53, %v108_v49  ;;  %v1547_v62 = vadd.f32 %v1546_v59, %v1257_v55  ;;  %v1548_v63 = vpop.f32.mrb[19].mxu1  ;;  %v114_v53 = vld [vmem:[#allocation2 + $0x70] sm:$0xff]  ;;  %v2295_v59 = vld [vmem:[%s4169_s2 + $0x60] sm:$0xff] }
 0x14a   :  { %v1904_v0 = vld [vmem:[#allocation2 + $0x30] sm:$0xff]  ;;  %v115_v60 = vld [vmem:[#allocation2 + $0x78] sm:$0xff] }
 0x14b   :  { %1469 = vmatmul.mubr.bf16.gmra.mrb[124].mxu0 %v3063_v52  ;;  %v2778_v2 = vpack.c.bf16 %v1904_v0, %v1904_v0  ;;  %v2417_v3 = vadd.f32 %v2289_v57, %v1904_v0  ;;  %1839 = vst.msk [vmem:[#allocation2 + $0x40] sm:$0xff] %vm35_vm0, %v1774_v61  ;;  %v1775_v4 = vadd.f32 %v1547_v62, %v109_v58 }
 0x14c   :  { %1758 = vmatmul.mubr.bf16.gmra.mrb[124].mxu1 %v3064_v56 }
 0x14d   :  { %v1905_v5 = vld [vmem:[#allocation2 + $0x38] sm:$0xff]  ;;  %2225 = vst.msk [vmem:[%s4170_s3 + $0x18] sm:$0xf] %vm2218_vm1, %v2778_v2 }
 0x14e   :  { %2481 = vst.msk [vmem:[%s4171_s4 + $0x30] sm:$0xff] %vm35_vm0, %v2417_v3  ;;  %v2779_v6 = vpack.c.bf16 %v1905_v5, %v1905_v5  ;;  %v2418_v7 = vadd.f32 %v2290_v1, %v1905_v5  ;;  %1840 = vst.msk [vmem:[#allocation2 + $0x48] sm:$0xff] %vm35_vm0, %v1775_v4  ;;  %v1262_v8 = vpop.f32.mrb[20].mxu0  ;;  %v1551_v10 = vpop.f32.mrb[20].mxu1  ;;  %v2296_v3 = vld [vmem:[%s4169_s2 + $0x68] sm:$0xff] }
 0x14f   :  { %v1264_v11 = vpop.f32.mrb[21].mxu0  ;;  %v1552_v12 = vadd.f32 %v1551_v10, %v1262_v8  ;;  %v1553_v13 = vpop.f32.mrb[21].mxu1 }
 0x150   :  { %2226 = vst.msk [vmem:[%s4170_s3 + $0x1c] sm:$0xf] %vm2218_vm1, %v2779_v6  ;;  %v1265_v14 = vpop.f32.mrb[22].mxu0  ;;  %v1554_v17 = vpop.f32.mrb[22].mxu1  ;;  %v116_v11 = vld [vmem:[#allocation2 + $0x80] sm:$0xff] }
 0x151   :  { %2482 = vst.msk [vmem:[%s4171_s4 + $0x38] sm:$0xff] %vm35_vm0, %v2418_v7  ;;  %v1267_v18 = vpop.f32.mrb[23].mxu0  ;;  %v1776_v19 = vadd.f32 %v1552_v12, %v110_v9  ;;  %v1555_v20 = vadd.f32 %v1554_v17, %v1265_v14  ;;  %v1556_v21 = vpop.f32.mrb[23].mxu1  ;;  %v2297_v17 = vld [vmem:[%s4169_s2 + $0x70] sm:$0xff] }
 0x152   :  { %v1906_v22 = vld [vmem:[#allocation2 + $0x40] sm:$0xff]  ;;  %v117_v18 = vld [vmem:[#allocation2 + $0x88] sm:$0xff] }
 0x153   :  { %v2780_v24 = vpack.c.bf16 %v1906_v22, %v1906_v22  ;;  %v2419_v25 = vadd.f32 %v2291_v15, %v1906_v22  ;;  %1841 = vst.msk [vmem:[#allocation2 + $0x50] sm:$0xff] %vm35_vm0, %v1776_v19  ;;  %v1777_v26 = vadd.f32 %v1555_v20, %v111_v16 }
 0x155   :  { %v1907_v27 = vld [vmem:[#allocation2 + $0x48] sm:$0xff]  ;;  %2227 = vst.msk [vmem:[%s4170_s3 + $0x20] sm:$0xf] %vm2218_vm1, %v2780_v24 }
 0x156   :  { %2483 = vst.msk [vmem:[%s4171_s4 + $0x40] sm:$0xff] %vm35_vm0, %v2419_v25  ;;  %v2781_v28 = vpack.c.bf16 %v1907_v27, %v1907_v27  ;;  %v2420_v29 = vadd.f32 %v2292_v23, %v1907_v27  ;;  %1842 = vst.msk [vmem:[#allocation2 + $0x58] sm:$0xff] %vm35_vm0, %v1777_v26  ;;  %v1270_v30 = vpop.f32.mrb[24].mxu0  ;;  %v1559_v32 = vpop.f32.mrb[24].mxu1  ;;  %v2298_v25 = vld [vmem:[%s4169_s2 + $0x78] sm:$0xff] }
 0x157   :  { %v1272_v33 = vpop.f32.mrb[25].mxu0  ;;  %v1560_v34 = vadd.f32 %v1559_v32, %v1270_v30  ;;  %v1561_v35 = vpop.f32.mrb[25].mxu1 }
 0x158   :  { %2228 = vst.msk [vmem:[%s4170_s3 + $0x24] sm:$0xf] %vm2218_vm1, %v2781_v28  ;;  %v1273_v36 = vpop.f32.mrb[26].mxu0  ;;  %v1562_v39 = vpop.f32.mrb[26].mxu1  ;;  %v118_v33 = vld [vmem:[#allocation2 + $0x90] sm:$0xff] }
 0x159   :  { %2484 = vst.msk [vmem:[%s4171_s4 + $0x48] sm:$0xff] %vm35_vm0, %v2420_v29  ;;  %v1275_v40 = vpop.f32.mrb[27].mxu0  ;;  %v1778_v41 = vadd.f32 %v1560_v34, %v112_v31  ;;  %v1563_v42 = vadd.f32 %v1562_v39, %v1273_v36  ;;  %v1564_v43 = vpop.f32.mrb[27].mxu1  ;;  %v2299_v39 = vld [vmem:[%s4169_s2 + $0x80] sm:$0xff] }
 0x15a   :  { %v1908_v44 = vld [vmem:[#allocation2 + $0x50] sm:$0xff]  ;;  %v119_v40 = vld [vmem:[#allocation2 + $0x98] sm:$0xff] }
 0x15b   :  { %v2782_v46 = vpack.c.bf16 %v1908_v44, %v1908_v44  ;;  %v2421_v47 = vadd.f32 %v2293_v37, %v1908_v44  ;;  %1843 = vst.msk [vmem:[#allocation2 + $0x60] sm:$0xff] %vm35_vm0, %v1778_v41  ;;  %v1779_v48 = vadd.f32 %v1563_v42, %v113_v38 }
 0x15d   :  { %v1909_v49 = vld [vmem:[#allocation2 + $0x58] sm:$0xff]  ;;  %2229 = vst.msk [vmem:[%s4170_s3 + $0x28] sm:$0xf] %vm2218_vm1, %v2782_v46 }
 0x15e   :  { %2485 = vst.msk [vmem:[%s4171_s4 + $0x50] sm:$0xff] %vm35_vm0, %v2421_v47  ;;  %v2783_v50 = vpack.c.bf16 %v1909_v49, %v1909_v49  ;;  %v2422_v51 = vadd.f32 %v2294_v45, %v1909_v49  ;;  %1844 = vst.msk [vmem:[#allocation2 + $0x68] sm:$0xff] %vm35_vm0, %v1779_v48  ;;  %v1278_v52 = vpop.f32.mrb[28].mxu0  ;;  %v1567_v54 = vpop.f32.mrb[28].mxu1  ;;  %v2300_v47 = vld [vmem:[%s4169_s2 + $0x88] sm:$0xff] }
 0x15f   :  { %v1280_v55 = vpop.f32.mrb[29].mxu0  ;;  %v1568_v56 = vadd.f32 %v1567_v54, %v1278_v52  ;;  %v1569_v57 = vpop.f32.mrb[29].mxu1 }
 0x160   :  { %2230 = vst.msk [vmem:[%s4170_s3 + $0x2c] sm:$0xf] %vm2218_vm1, %v2783_v50  ;;  %v1281_v58 = vpop.f32.mrb[30].mxu0  ;;  %v1570_v61 = vpop.f32.mrb[30].mxu1  ;;  %v120_v55 = vld [vmem:[#allocation2 + $0xa0] sm:$0xff] }
 0x161   :  { %2486 = vst.msk [vmem:[%s4171_s4 + $0x58] sm:$0xff] %vm35_vm0, %v2422_v51  ;;  %v1283_v62 = vpop.f32.mrb[31].mxu0  ;;  %v1780_v63 = vadd.f32 %v1568_v56, %v114_v53  ;;  %v1571_v0 = vadd.f32 %v1570_v61, %v1281_v58  ;;  %v1572_v1 = vpop.f32.mrb[31].mxu1  ;;  %v2301_v61 = vld [vmem:[%s4169_s2 + $0x90] sm:$0xff] }
 0x162   :  { %v1910_v2 = vld [vmem:[#allocation2 + $0x60] sm:$0xff]  ;;  %v121_v62 = vld [vmem:[#allocation2 + $0xa8] sm:$0xff] }
 0x163   :  { %v2784_v4 = vpack.c.bf16 %v1910_v2, %v1910_v2  ;;  %v2423_v5 = vadd.f32 %v2295_v59, %v1910_v2  ;;  %1845 = vst.msk [vmem:[#allocation2 + $0x70] sm:$0xff] %vm35_vm0, %v1780_v63  ;;  %v1781_v6 = vadd.f32 %v1571_v0, %v115_v60 }
 0x165   :  { %v1911_v7 = vld [vmem:[#allocation2 + $0x68] sm:$0xff]  ;;  %2231 = vst.msk [vmem:[%s4170_s3 + $0x30] sm:$0xf] %vm2218_vm1, %v2784_v4 }
 0x166   :  { %2487 = vst.msk [vmem:[%s4171_s4 + $0x60] sm:$0xff] %vm35_vm0, %v2423_v5  ;;  %v2785_v8 = vpack.c.bf16 %v1911_v7, %v1911_v7  ;;  %v2424_v9 = vadd.f32 %v2296_v3, %v1911_v7  ;;  %1846 = vst.msk [vmem:[#allocation2 + $0x78] sm:$0xff] %vm35_vm0, %v1781_v6  ;;  %v1286_v10 = vpop.f32.mrb[32].mxu0  ;;  %v1575_v12 = vpop.f32.mrb[32].mxu1  ;;  %v2302_v5 = vld [vmem:[%s4169_s2 + $0x98] sm:$0xff] }
 0x167   :  { %v1288_v13 = vpop.f32.mrb[33].mxu0  ;;  %v1576_v14 = vadd.f32 %v1575_v12, %v1286_v10  ;;  %v1577_v15 = vpop.f32.mrb[33].mxu1 }
 0x168   :  { %2232 = vst.msk [vmem:[%s4170_s3 + $0x34] sm:$0xf] %vm2218_vm1, %v2785_v8  ;;  %v1289_v16 = vpop.f32.mrb[34].mxu0  ;;  %v1578_v19 = vpop.f32.mrb[34].mxu1  ;;  %v122_v13 = vld [vmem:[#allocation2 + $0xb0] sm:$0xff] }
 0x169   :  { %2488 = vst.msk [vmem:[%s4171_s4 + $0x68] sm:$0xff] %vm35_vm0, %v2424_v9  ;;  %v1291_v20 = vpop.f32.mrb[35].mxu0  ;;  %v1782_v21 = vadd.f32 %v1576_v14, %v116_v11  ;;  %v1579_v22 = vadd.f32 %v1578_v19, %v1289_v16  ;;  %v1580_v23 = vpop.f32.mrb[35].mxu1  ;;  %v2303_v19 = vld [vmem:[%s4169_s2 + $0xa0] sm:$0xff] }
 0x16a   :  { %v1912_v24 = vld [vmem:[#allocation2 + $0x70] sm:$0xff]  ;;  %v123_v20 = vld [vmem:[#allocation2 + $0xb8] sm:$0xff] }
 0x16b   :  { %v2786_v26 = vpack.c.bf16 %v1912_v24, %v1912_v24  ;;  %v2425_v27 = vadd.f32 %v2297_v17, %v1912_v24  ;;  %1847 = vst.msk [vmem:[#allocation2 + $0x80] sm:$0xff] %vm35_vm0, %v1782_v21  ;;  %v1783_v28 = vadd.f32 %v1579_v22, %v117_v18 }
 0x16d   :  { %v1913_v29 = vld [vmem:[#allocation2 + $0x78] sm:$0xff]  ;;  %2233 = vst.msk [vmem:[%s4170_s3 + $0x38] sm:$0xf] %vm2218_vm1, %v2786_v26 }
 0x16e   :  { %2489 = vst.msk [vmem:[%s4171_s4 + $0x70] sm:$0xff] %vm35_vm0, %v2425_v27  ;;  %v2787_v30 = vpack.c.bf16 %v1913_v29, %v1913_v29  ;;  %v2426_v31 = vadd.f32 %v2298_v25, %v1913_v29  ;;  %1848 = vst.msk [vmem:[#allocation2 + $0x88] sm:$0xff] %vm35_vm0, %v1783_v28  ;;  %v1294_v32 = vpop.f32.mrb[36].mxu0  ;;  %v1583_v34 = vpop.f32.mrb[36].mxu1  ;;  %v2304_v27 = vld [vmem:[%s4169_s2 + $0xa8] sm:$0xff] }
 0x16f   :  { %v1296_v35 = vpop.f32.mrb[37].mxu0  ;;  %v1584_v36 = vadd.f32 %v1583_v34, %v1294_v32  ;;  %v1585_v37 = vpop.f32.mrb[37].mxu1 }
 0x170   :  { %2234 = vst.msk [vmem:[%s4170_s3 + $0x3c] sm:$0xf] %vm2218_vm1, %v2787_v30  ;;  %v1297_v38 = vpop.f32.mrb[38].mxu0  ;;  %v1586_v41 = vpop.f32.mrb[38].mxu1  ;;  %v124_v35 = vld [vmem:[#allocation2 + $0xc0] sm:$0xff] }
 0x171   :  { %2490 = vst.msk [vmem:[%s4171_s4 + $0x78] sm:$0xff] %vm35_vm0, %v2426_v31  ;;  %v1299_v42 = vpop.f32.mrb[39].mxu0  ;;  %v1784_v43 = vadd.f32 %v1584_v36, %v118_v33  ;;  %v1587_v44 = vadd.f32 %v1586_v41, %v1297_v38  ;;  %v1588_v45 = vpop.f32.mrb[39].mxu1  ;;  %v2305_v41 = vld [vmem:[%s4169_s2 + $0xb0] sm:$0xff] }
 0x172   :  { %v1914_v46 = vld [vmem:[#allocation2 + $0x80] sm:$0xff]  ;;  %v125_v42 = vld [vmem:[#allocation2 + $0xc8] sm:$0xff] }
 0x173   :  { %v2788_v48 = vpack.c.bf16 %v1914_v46, %v1914_v46  ;;  %v2427_v49 = vadd.f32 %v2299_v39, %v1914_v46  ;;  %1849 = vst.msk [vmem:[#allocation2 + $0x90] sm:$0xff] %vm35_vm0, %v1784_v43  ;;  %v1785_v50 = vadd.f32 %v1587_v44, %v119_v40 }
 0x175   :  { %v1915_v51 = vld [vmem:[#allocation2 + $0x88] sm:$0xff]  ;;  %2235 = vst.msk [vmem:[%s4170_s3 + $0x40] sm:$0xf] %vm2218_vm1, %v2788_v48 }
 0x176   :  { %2491 = vst.msk [vmem:[%s4171_s4 + $0x80] sm:$0xff] %vm35_vm0, %v2427_v49  ;;  %v2789_v52 = vpack.c.bf16 %v1915_v51, %v1915_v51  ;;  %v2428_v53 = vadd.f32 %v2300_v47, %v1915_v51  ;;  %1850 = vst.msk [vmem:[#allocation2 + $0x98] sm:$0xff] %vm35_vm0, %v1785_v50  ;;  %v1302_v54 = vpop.f32.mrb[40].mxu0  ;;  %v1591_v56 = vpop.f32.mrb[40].mxu1  ;;  %v2306_v49 = vld [vmem:[%s4169_s2 + $0xb8] sm:$0xff] }
 0x177   :  { %v1304_v57 = vpop.f32.mrb[41].mxu0  ;;  %v1592_v58 = vadd.f32 %v1591_v56, %v1302_v54  ;;  %v1593_v59 = vpop.f32.mrb[41].mxu1 }
 0x178   :  { %2236 = vst.msk [vmem:[%s4170_s3 + $0x44] sm:$0xf] %vm2218_vm1, %v2789_v52  ;;  %v1305_v60 = vpop.f32.mrb[42].mxu0  ;;  %v1594_v63 = vpop.f32.mrb[42].mxu1  ;;  %v126_v57 = vld [vmem:[#allocation2 + $0xd0] sm:$0xff] }
 0x179   :  { %2492 = vst.msk [vmem:[%s4171_s4 + $0x88] sm:$0xff] %vm35_vm0, %v2428_v53  ;;  %v1307_v0 = vpop.f32.mrb[43].mxu0  ;;  %v1786_v1 = vadd.f32 %v1592_v58, %v120_v55  ;;  %v1595_v2 = vadd.f32 %v1594_v63, %v1305_v60  ;;  %v1596_v3 = vpop.f32.mrb[43].mxu1  ;;  %v2307_v63 = vld [vmem:[%s4169_s2 + $0xc0] sm:$0xff] }
 0x17a   :  { %v1916_v4 = vld [vmem:[#allocation2 + $0x90] sm:$0xff]  ;;  %v127_v0 = vld [vmem:[#allocation2 + $0xd8] sm:$0xff] }
 0x17b   :  { %v2790_v6 = vpack.c.bf16 %v1916_v4, %v1916_v4  ;;  %v2429_v7 = vadd.f32 %v2301_v61, %v1916_v4  ;;  %1851 = vst.msk [vmem:[#allocation2 + $0xa0] sm:$0xff] %vm35_vm0, %v1786_v1  ;;  %v1787_v8 = vadd.f32 %v1595_v2, %v121_v62 }
 0x17d   :  { %v1917_v9 = vld [vmem:[#allocation2 + $0x98] sm:$0xff]  ;;  %2237 = vst.msk [vmem:[%s4170_s3 + $0x48] sm:$0xf] %vm2218_vm1, %v2790_v6 }
 0x17e   :  { %2493 = vst.msk [vmem:[%s4171_s4 + $0x90] sm:$0xff] %vm35_vm0, %v2429_v7  ;;  %v2791_v10 = vpack.c.bf16 %v1917_v9, %v1917_v9  ;;  %v2430_v11 = vadd.f32 %v2302_v5, %v1917_v9  ;;  %1852 = vst.msk [vmem:[#allocation2 + $0xa8] sm:$0xff] %vm35_vm0, %v1787_v8  ;;  %v1310_v12 = vpop.f32.mrb[44].mxu0  ;;  %v1599_v14 = vpop.f32.mrb[44].mxu1  ;;  %v2308_v7 = vld [vmem:[%s4169_s2 + $0xc8] sm:$0xff] }
 0x17f   :  { %v1312_v15 = vpop.f32.mrb[45].mxu0  ;;  %v1600_v16 = vadd.f32 %v1599_v14, %v1310_v12  ;;  %v1601_v17 = vpop.f32.mrb[45].mxu1 }
 0x180   :  { %2238 = vst.msk [vmem:[%s4170_s3 + $0x4c] sm:$0xf] %vm2218_vm1, %v2791_v10  ;;  %v1313_v18 = vpop.f32.mrb[46].mxu0  ;;  %v1602_v21 = vpop.f32.mrb[46].mxu1  ;;  %v128_v15 = vld [vmem:[#allocation2 + $0xe0] sm:$0xff] }
 0x181   :  { %2494 = vst.msk [vmem:[%s4171_s4 + $0x98] sm:$0xff] %vm35_vm0, %v2430_v11  ;;  %v1315_v22 = vpop.f32.mrb[47].mxu0  ;;  %v1788_v23 = vadd.f32 %v1600_v16, %v122_v13  ;;  %v1603_v24 = vadd.f32 %v1602_v21, %v1313_v18  ;;  %v1604_v25 = vpop.f32.mrb[47].mxu1  ;;  %v2309_v21 = vld [vmem:[%s4169_s2 + $0xd0] sm:$0xff] }
 0x182   :  { %v1918_v26 = vld [vmem:[#allocation2 + $0xa0] sm:$0xff]  ;;  %v129_v22 = vld [vmem:[#allocation2 + $0xe8] sm:$0xff] }
 0x183   :  { %v2792_v28 = vpack.c.bf16 %v1918_v26, %v1918_v26  ;;  %v2431_v29 = vadd.f32 %v2303_v19, %v1918_v26  ;;  %1853 = vst.msk [vmem:[#allocation2 + $0xb0] sm:$0xff] %vm35_vm0, %v1788_v23  ;;  %v1789_v30 = vadd.f32 %v1603_v24, %v123_v20 }
 0x185   :  { %v1919_v31 = vld [vmem:[#allocation2 + $0xa8] sm:$0xff]  ;;  %2239 = vst.msk [vmem:[%s4170_s3 + $0x50] sm:$0xf] %vm2218_vm1, %v2792_v28 }
 0x186   :  { %2495 = vst.msk [vmem:[%s4171_s4 + $0xa0] sm:$0xff] %vm35_vm0, %v2431_v29  ;;  %v2793_v32 = vpack.c.bf16 %v1919_v31, %v1919_v31  ;;  %v2432_v33 = vadd.f32 %v2304_v27, %v1919_v31  ;;  %1854 = vst.msk [vmem:[#allocation2 + $0xb8] sm:$0xff] %vm35_vm0, %v1789_v30  ;;  %v1318_v34 = vpop.f32.mrb[48].mxu0  ;;  %v1607_v36 = vpop.f32.mrb[48].mxu1  ;;  %v2310_v29 = vld [vmem:[%s4169_s2 + $0xd8] sm:$0xff] }
 0x187   :  { %v1320_v37 = vpop.f32.mrb[49].mxu0  ;;  %v1608_v38 = vadd.f32 %v1607_v36, %v1318_v34  ;;  %v1609_v39 = vpop.f32.mrb[49].mxu1 }
 0x188   :  { %2240 = vst.msk [vmem:[%s4170_s3 + $0x54] sm:$0xf] %vm2218_vm1, %v2793_v32  ;;  %v1321_v40 = vpop.f32.mrb[50].mxu0  ;;  %v1610_v43 = vpop.f32.mrb[50].mxu1  ;;  %v130_v37 = vld [vmem:[#allocation2 + $0xf0] sm:$0xff] }
 0x189   :  { %2496 = vst.msk [vmem:[%s4171_s4 + $0xa8] sm:$0xff] %vm35_vm0, %v2432_v33  ;;  %v1323_v44 = vpop.f32.mrb[51].mxu0  ;;  %v1790_v45 = vadd.f32 %v1608_v38, %v124_v35  ;;  %v1611_v46 = vadd.f32 %v1610_v43, %v1321_v40  ;;  %v1612_v47 = vpop.f32.mrb[51].mxu1  ;;  %v2311_v43 = vld [vmem:[%s4169_s2 + $0xe0] sm:$0xff] }
 0x18a   :  { %v1920_v48 = vld [vmem:[#allocation2 + $0xb0] sm:$0xff]  ;;  %v131_v44 = vld [vmem:[#allocation2 + $0xf8] sm:$0xff] }
 0x18b   :  { %v2794_v50 = vpack.c.bf16 %v1920_v48, %v1920_v48  ;;  %v2433_v51 = vadd.f32 %v2305_v41, %v1920_v48  ;;  %1855 = vst.msk [vmem:[#allocation2 + $0xc0] sm:$0xff] %vm35_vm0, %v1790_v45  ;;  %v1791_v52 = vadd.f32 %v1611_v46, %v125_v42 }
 0x18d   :  { %v1921_v53 = vld [vmem:[#allocation2 + $0xb8] sm:$0xff]  ;;  %2241 = vst.msk [vmem:[%s4170_s3 + $0x58] sm:$0xf] %vm2218_vm1, %v2794_v50 }
 0x18e   :  { %2497 = vst.msk [vmem:[%s4171_s4 + $0xb0] sm:$0xff] %vm35_vm0, %v2433_v51  ;;  %v2795_v54 = vpack.c.bf16 %v1921_v53, %v1921_v53  ;;  %v2434_v55 = vadd.f32 %v2306_v49, %v1921_v53  ;;  %1856 = vst.msk [vmem:[#allocation2 + $0xc8] sm:$0xff] %vm35_vm0, %v1791_v52  ;;  %v1326_v56 = vpop.f32.mrb[52].mxu0  ;;  %v1615_v58 = vpop.f32.mrb[52].mxu1  ;;  %v2312_v51 = vld [vmem:[%s4169_s2 + $0xe8] sm:$0xff] }
 0x18f   :  { %v1328_v59 = vpop.f32.mrb[53].mxu0  ;;  %v1616_v60 = vadd.f32 %v1615_v58, %v1326_v56  ;;  %v1617_v61 = vpop.f32.mrb[53].mxu1 }
 0x190   :  { %2242 = vst.msk [vmem:[%s4170_s3 + $0x5c] sm:$0xf] %vm2218_vm1, %v2795_v54  ;;  %v1329_v62 = vpop.f32.mrb[54].mxu0  ;;  %v1618_v1 = vpop.f32.mrb[54].mxu1  ;;  %v132_v59 = vld [vmem:[#allocation2 + $0x100] sm:$0xff] }
 0x191   :  { %2498 = vst.msk [vmem:[%s4171_s4 + $0xb8] sm:$0xff] %vm35_vm0, %v2434_v55  ;;  %v1331_v2 = vpop.f32.mrb[55].mxu0  ;;  %v1792_v3 = vadd.f32 %v1616_v60, %v126_v57  ;;  %v1619_v4 = vadd.f32 %v1618_v1, %v1329_v62  ;;  %v1620_v5 = vpop.f32.mrb[55].mxu1  ;;  %v2313_v1 = vld [vmem:[%s4169_s2 + $0xf0] sm:$0xff] }
 0x192   :  { %v1922_v6 = vld [vmem:[#allocation2 + $0xc0] sm:$0xff]  ;;  %v133_v2 = vld [vmem:[#allocation2 + $0x108] sm:$0xff] }
 0x193   :  { %v2796_v8 = vpack.c.bf16 %v1922_v6, %v1922_v6  ;;  %v2435_v9 = vadd.f32 %v2307_v63, %v1922_v6  ;;  %1857 = vst.msk [vmem:[#allocation2 + $0xd0] sm:$0xff] %vm35_vm0, %v1792_v3  ;;  %v1793_v10 = vadd.f32 %v1619_v4, %v127_v0 }
 0x195   :  { %v1923_v11 = vld [vmem:[#allocation2 + $0xc8] sm:$0xff]  ;;  %2243 = vst.msk [vmem:[%s4170_s3 + $0x60] sm:$0xf] %vm2218_vm1, %v2796_v8 }
 0x196   :  { %2499 = vst.msk [vmem:[%s4171_s4 + $0xc0] sm:$0xff] %vm35_vm0, %v2435_v9  ;;  %v2797_v12 = vpack.c.bf16 %v1923_v11, %v1923_v11  ;;  %v2436_v13 = vadd.f32 %v2308_v7, %v1923_v11  ;;  %1858 = vst.msk [vmem:[#allocation2 + $0xd8] sm:$0xff] %vm35_vm0, %v1793_v10  ;;  %v1334_v14 = vpop.f32.mrb[56].mxu0  ;;  %v1623_v16 = vpop.f32.mrb[56].mxu1  ;;  %v2314_v9 = vld [vmem:[%s4169_s2 + $0xf8] sm:$0xff] }
 0x197   :  { %v1336_v17 = vpop.f32.mrb[57].mxu0  ;;  %v1624_v18 = vadd.f32 %v1623_v16, %v1334_v14  ;;  %v1625_v19 = vpop.f32.mrb[57].mxu1 }
 0x198   :  { %2244 = vst.msk [vmem:[%s4170_s3 + $0x64] sm:$0xf] %vm2218_vm1, %v2797_v12  ;;  %v1337_v20 = vpop.f32.mrb[58].mxu0  ;;  %v1626_v23 = vpop.f32.mrb[58].mxu1  ;;  %v134_v17 = vld [vmem:[#allocation2 + $0x110] sm:$0xff] }
 0x199   :  { %2500 = vst.msk [vmem:[%s4171_s4 + $0xc8] sm:$0xff] %vm35_vm0, %v2436_v13  ;;  %v1339_v24 = vpop.f32.mrb[59].mxu0  ;;  %v1794_v25 = vadd.f32 %v1624_v18, %v128_v15  ;;  %v1627_v26 = vadd.f32 %v1626_v23, %v1337_v20  ;;  %v1628_v27 = vpop.f32.mrb[59].mxu1  ;;  %v2315_v23 = vld [vmem:[%s4169_s2 + $0x100] sm:$0xff] }
 0x19a   :  { %v1924_v28 = vld [vmem:[#allocation2 + $0xd0] sm:$0xff]  ;;  %v135_v24 = vld [vmem:[#allocation2 + $0x118] sm:$0xff] }
 0x19b   :  { %v2798_v30 = vpack.c.bf16 %v1924_v28, %v1924_v28  ;;  %v2437_v31 = vadd.f32 %v2309_v21, %v1924_v28  ;;  %1859 = vst.msk [vmem:[#allocation2 + $0xe0] sm:$0xff] %vm35_vm0, %v1794_v25  ;;  %v1795_v32 = vadd.f32 %v1627_v26, %v129_v22 }
 0x19d   :  { %v1925_v33 = vld [vmem:[#allocation2 + $0xd8] sm:$0xff]  ;;  %2245 = vst.msk [vmem:[%s4170_s3 + $0x68] sm:$0xf] %vm2218_vm1, %v2798_v30 }
 0x19e   :  { %2501 = vst.msk [vmem:[%s4171_s4 + $0xd0] sm:$0xff] %vm35_vm0, %v2437_v31  ;;  %v2799_v34 = vpack.c.bf16 %v1925_v33, %v1925_v33  ;;  %v2438_v35 = vadd.f32 %v2310_v29, %v1925_v33  ;;  %1860 = vst.msk [vmem:[#allocation2 + $0xe8] sm:$0xff] %vm35_vm0, %v1795_v32  ;;  %v1342_v36 = vpop.f32.mrb[60].mxu0  ;;  %v1631_v38 = vpop.f32.mrb[60].mxu1  ;;  %v2316_v31 = vld [vmem:[%s4169_s2 + $0x108] sm:$0xff] }
 0x19f   :  { %v1344_v39 = vpop.f32.mrb[61].mxu0  ;;  %v1632_v40 = vadd.f32 %v1631_v38, %v1342_v36  ;;  %v1633_v41 = vpop.f32.mrb[61].mxu1 }
 0x1a0   :  { %2246 = vst.msk [vmem:[%s4170_s3 + $0x6c] sm:$0xf] %vm2218_vm1, %v2799_v34  ;;  %v1345_v42 = vpop.f32.mrb[62].mxu0  ;;  %v1634_v45 = vpop.f32.mrb[62].mxu1  ;;  %v136_v39 = vld [vmem:[#allocation2 + $0x120] sm:$0xff] }
 0x1a1   :  { %2502 = vst.msk [vmem:[%s4171_s4 + $0xd8] sm:$0xff] %vm35_vm0, %v2438_v35  ;;  %v1347_v46 = vpop.f32.mrb[63].mxu0  ;;  %v1796_v47 = vadd.f32 %v1632_v40, %v130_v37  ;;  %v1635_v48 = vadd.f32 %v1634_v45, %v1345_v42  ;;  %v1636_v49 = vpop.f32.mrb[63].mxu1  ;;  %v2317_v45 = vld [vmem:[%s4169_s2 + $0x110] sm:$0xff] }
 0x1a2   :  { %v1926_v50 = vld [vmem:[#allocation2 + $0xe0] sm:$0xff]  ;;  %v137_v46 = vld [vmem:[#allocation2 + $0x128] sm:$0xff] }
 0x1a3   :  { %v2800_v52 = vpack.c.bf16 %v1926_v50, %v1926_v50  ;;  %v2439_v53 = vadd.f32 %v2311_v43, %v1926_v50  ;;  %1861 = vst.msk [vmem:[#allocation2 + $0xf0] sm:$0xff] %vm35_vm0, %v1796_v47  ;;  %v1797_v54 = vadd.f32 %v1635_v48, %v131_v44 }
 0x1a5   :  { %v1927_v55 = vld [vmem:[#allocation2 + $0xe8] sm:$0xff]  ;;  %2247 = vst.msk [vmem:[%s4170_s3 + $0x70] sm:$0xf] %vm2218_vm1, %v2800_v52 }
 0x1a6   :  { %2503 = vst.msk [vmem:[%s4171_s4 + $0xe0] sm:$0xff] %vm35_vm0, %v2439_v53  ;;  %v2801_v56 = vpack.c.bf16 %v1927_v55, %v1927_v55  ;;  %v2440_v57 = vadd.f32 %v2312_v51, %v1927_v55  ;;  %1862 = vst.msk [vmem:[#allocation2 + $0xf8] sm:$0xff] %vm35_vm0, %v1797_v54  ;;  %v1350_v58 = vpop.f32.mrb[64].mxu0  ;;  %v1639_v60 = vpop.f32.mrb[64].mxu1  ;;  %v2318_v53 = vld [vmem:[%s4169_s2 + $0x118] sm:$0xff] }
 0x1a7   :  { %v1352_v61 = vpop.f32.mrb[65].mxu0  ;;  %v1640_v62 = vadd.f32 %v1639_v60, %v1350_v58  ;;  %v1641_v63 = vpop.f32.mrb[65].mxu1 }
 0x1a8   :  { %2248 = vst.msk [vmem:[%s4170_s3 + $0x74] sm:$0xf] %vm2218_vm1, %v2801_v56  ;;  %v1353_v0 = vpop.f32.mrb[66].mxu0  ;;  %v1642_v3 = vpop.f32.mrb[66].mxu1  ;;  %v138_v61 = vld [vmem:[#allocation2 + $0x130] sm:$0xff] }
 0x1a9   :  { %2504 = vst.msk [vmem:[%s4171_s4 + $0xe8] sm:$0xff] %vm35_vm0, %v2440_v57  ;;  %v1355_v4 = vpop.f32.mrb[67].mxu0  ;;  %v1798_v5 = vadd.f32 %v1640_v62, %v132_v59  ;;  %v1643_v6 = vadd.f32 %v1642_v3, %v1353_v0  ;;  %v1644_v7 = vpop.f32.mrb[67].mxu1  ;;  %v2319_v3 = vld [vmem:[%s4169_s2 + $0x120] sm:$0xff] }
 0x1aa   :  { %v1928_v8 = vld [vmem:[#allocation2 + $0xf0] sm:$0xff]  ;;  %v139_v4 = vld [vmem:[#allocation2 + $0x138] sm:$0xff] }
 0x1ab   :  { %v2802_v10 = vpack.c.bf16 %v1928_v8, %v1928_v8  ;;  %v2441_v11 = vadd.f32 %v2313_v1, %v1928_v8  ;;  %1863 = vst.msk [vmem:[#allocation2 + $0x100] sm:$0xff] %vm35_vm0, %v1798_v5  ;;  %v1799_v12 = vadd.f32 %v1643_v6, %v133_v2 }
 0x1ad   :  { %v1929_v13 = vld [vmem:[#allocation2 + $0xf8] sm:$0xff]  ;;  %2249 = vst.msk [vmem:[%s4170_s3 + $0x78] sm:$0xf] %vm2218_vm1, %v2802_v10 }
 0x1ae   :  { %2505 = vst.msk [vmem:[%s4171_s4 + $0xf0] sm:$0xff] %vm35_vm0, %v2441_v11  ;;  %v2803_v14 = vpack.c.bf16 %v1929_v13, %v1929_v13  ;;  %v2442_v15 = vadd.f32 %v2314_v9, %v1929_v13  ;;  %1864 = vst.msk [vmem:[#allocation2 + $0x108] sm:$0xff] %vm35_vm0, %v1799_v12  ;;  %v1358_v16 = vpop.f32.mrb[68].mxu0  ;;  %v1647_v18 = vpop.f32.mrb[68].mxu1  ;;  %v2320_v11 = vld [vmem:[%s4169_s2 + $0x128] sm:$0xff] }
 0x1af   :  { %v1360_v19 = vpop.f32.mrb[69].mxu0  ;;  %v1648_v20 = vadd.f32 %v1647_v18, %v1358_v16  ;;  %v1649_v21 = vpop.f32.mrb[69].mxu1 }
 0x1b0   :  { %2250 = vst.msk [vmem:[%s4170_s3 + $0x7c] sm:$0xf] %vm2218_vm1, %v2803_v14  ;;  %v1361_v22 = vpop.f32.mrb[70].mxu0  ;;  %v1650_v25 = vpop.f32.mrb[70].mxu1  ;;  %v140_v19 = vld [vmem:[#allocation2 + $0x140] sm:$0xff] }
 0x1b1   :  { %2506 = vst.msk [vmem:[%s4171_s4 + $0xf8] sm:$0xff] %vm35_vm0, %v2442_v15  ;;  %v1363_v26 = vpop.f32.mrb[71].mxu0  ;;  %v1800_v27 = vadd.f32 %v1648_v20, %v134_v17  ;;  %v1651_v28 = vadd.f32 %v1650_v25, %v1361_v22  ;;  %v1652_v29 = vpop.f32.mrb[71].mxu1  ;;  %v2321_v25 = vld [vmem:[%s4169_s2 + $0x130] sm:$0xff] }
 0x1b2   :  { %v1930_v30 = vld [vmem:[#allocation2 + $0x100] sm:$0xff]  ;;  %v141_v26 = vld [vmem:[#allocation2 + $0x148] sm:$0xff] }
 0x1b3   :  { %v2804_v32 = vpack.c.bf16 %v1930_v30, %v1930_v30  ;;  %v2443_v33 = vadd.f32 %v2315_v23, %v1930_v30  ;;  %1865 = vst.msk [vmem:[#allocation2 + $0x110] sm:$0xff] %vm35_vm0, %v1800_v27  ;;  %v1801_v34 = vadd.f32 %v1651_v28, %v135_v24 }
 0x1b5   :  { %v1931_v35 = vld [vmem:[#allocation2 + $0x108] sm:$0xff]  ;;  %2251 = vst.msk [vmem:[%s4170_s3 + $0x80] sm:$0xf] %vm2218_vm1, %v2804_v32 }
 0x1b6   :  { %2507 = vst.msk [vmem:[%s4171_s4 + $0x100] sm:$0xff] %vm35_vm0, %v2443_v33  ;;  %v2805_v36 = vpack.c.bf16 %v1931_v35, %v1931_v35  ;;  %v2444_v37 = vadd.f32 %v2316_v31, %v1931_v35  ;;  %1866 = vst.msk [vmem:[#allocation2 + $0x118] sm:$0xff] %vm35_vm0, %v1801_v34  ;;  %v1366_v38 = vpop.f32.mrb[72].mxu0  ;;  %v1655_v40 = vpop.f32.mrb[72].mxu1  ;;  %v2322_v33 = vld [vmem:[%s4169_s2 + $0x138] sm:$0xff] }
 0x1b7   :  { %v1368_v41 = vpop.f32.mrb[73].mxu0  ;;  %v1656_v42 = vadd.f32 %v1655_v40, %v1366_v38  ;;  %v1657_v43 = vpop.f32.mrb[73].mxu1 }
 0x1b8   :  { %2252 = vst.msk [vmem:[%s4170_s3 + $0x84] sm:$0xf] %vm2218_vm1, %v2805_v36  ;;  %v1369_v44 = vpop.f32.mrb[74].mxu0  ;;  %v1658_v47 = vpop.f32.mrb[74].mxu1  ;;  %v142_v41 = vld [vmem:[#allocation2 + $0x150] sm:$0xff] }
 0x1b9   :  { %2508 = vst.msk [vmem:[%s4171_s4 + $0x108] sm:$0xff] %vm35_vm0, %v2444_v37  ;;  %v1371_v48 = vpop.f32.mrb[75].mxu0  ;;  %v1802_v49 = vadd.f32 %v1656_v42, %v136_v39  ;;  %v1659_v50 = vadd.f32 %v1658_v47, %v1369_v44  ;;  %v1660_v51 = vpop.f32.mrb[75].mxu1  ;;  %v2323_v47 = vld [vmem:[%s4169_s2 + $0x140] sm:$0xff] }
 0x1ba   :  { %v1932_v52 = vld [vmem:[#allocation2 + $0x110] sm:$0xff]  ;;  %v143_v48 = vld [vmem:[#allocation2 + $0x158] sm:$0xff] }
 0x1bb   :  { %v2806_v54 = vpack.c.bf16 %v1932_v52, %v1932_v52  ;;  %v2445_v55 = vadd.f32 %v2317_v45, %v1932_v52  ;;  %1867 = vst.msk [vmem:[#allocation2 + $0x120] sm:$0xff] %vm35_vm0, %v1802_v49  ;;  %v1803_v56 = vadd.f32 %v1659_v50, %v137_v46 }
 0x1bd   :  { %v1933_v57 = vld [vmem:[#allocation2 + $0x118] sm:$0xff]  ;;  %2253 = vst.msk [vmem:[%s4170_s3 + $0x88] sm:$0xf] %vm2218_vm1, %v2806_v54 }
 0x1be   :  { %2509 = vst.msk [vmem:[%s4171_s4 + $0x110] sm:$0xff] %vm35_vm0, %v2445_v55  ;;  %v2807_v58 = vpack.c.bf16 %v1933_v57, %v1933_v57  ;;  %v2446_v59 = vadd.f32 %v2318_v53, %v1933_v57  ;;  %1868 = vst.msk [vmem:[#allocation2 + $0x128] sm:$0xff] %vm35_vm0, %v1803_v56  ;;  %v1374_v60 = vpop.f32.mrb[76].mxu0  ;;  %v1663_v62 = vpop.f32.mrb[76].mxu1  ;;  %v2324_v55 = vld [vmem:[%s4169_s2 + $0x148] sm:$0xff] }
 0x1bf   :  { %v1376_v63 = vpop.f32.mrb[77].mxu0  ;;  %v1664_v0 = vadd.f32 %v1663_v62, %v1374_v60  ;;  %v1665_v1 = vpop.f32.mrb[77].mxu1 }
 0x1c0   :  { %2254 = vst.msk [vmem:[%s4170_s3 + $0x8c] sm:$0xf] %vm2218_vm1, %v2807_v58  ;;  %v1377_v2 = vpop.f32.mrb[78].mxu0  ;;  %v1666_v5 = vpop.f32.mrb[78].mxu1  ;;  %v144_v63 = vld [vmem:[#allocation2 + $0x160] sm:$0xff] }
 0x1c1   :  { %2510 = vst.msk [vmem:[%s4171_s4 + $0x118] sm:$0xff] %vm35_vm0, %v2446_v59  ;;  %v1379_v6 = vpop.f32.mrb[79].mxu0  ;;  %v1804_v7 = vadd.f32 %v1664_v0, %v138_v61  ;;  %v1667_v8 = vadd.f32 %v1666_v5, %v1377_v2  ;;  %v1668_v9 = vpop.f32.mrb[79].mxu1  ;;  %v2325_v5 = vld [vmem:[%s4169_s2 + $0x150] sm:$0xff] }
 0x1c2   :  { %v1934_v10 = vld [vmem:[#allocation2 + $0x120] sm:$0xff]  ;;  %v145_v6 = vld [vmem:[#allocation2 + $0x168] sm:$0xff] }
 0x1c3   :  { %v2808_v12 = vpack.c.bf16 %v1934_v10, %v1934_v10  ;;  %v2447_v13 = vadd.f32 %v2319_v3, %v1934_v10  ;;  %1869 = vst.msk [vmem:[#allocation2 + $0x130] sm:$0xff] %vm35_vm0, %v1804_v7  ;;  %v1805_v14 = vadd.f32 %v1667_v8, %v139_v4 }
 0x1c5   :  { %v1935_v15 = vld [vmem:[#allocation2 + $0x128] sm:$0xff]  ;;  %2255 = vst.msk [vmem:[%s4170_s3 + $0x90] sm:$0xf] %vm2218_vm1, %v2808_v12 }
 0x1c6   :  { %2511 = vst.msk [vmem:[%s4171_s4 + $0x120] sm:$0xff] %vm35_vm0, %v2447_v13  ;;  %v2809_v16 = vpack.c.bf16 %v1935_v15, %v1935_v15  ;;  %v2448_v17 = vadd.f32 %v2320_v11, %v1935_v15  ;;  %1870 = vst.msk [vmem:[#allocation2 + $0x138] sm:$0xff] %vm35_vm0, %v1805_v14  ;;  %v1382_v18 = vpop.f32.mrb[80].mxu0  ;;  %v1671_v20 = vpop.f32.mrb[80].mxu1  ;;  %v2326_v13 = vld [vmem:[%s4169_s2 + $0x158] sm:$0xff] }
 0x1c7   :  { %v1384_v21 = vpop.f32.mrb[81].mxu0  ;;  %v1672_v22 = vadd.f32 %v1671_v20, %v1382_v18  ;;  %v1673_v23 = vpop.f32.mrb[81].mxu1 }
 0x1c8   :  { %2256 = vst.msk [vmem:[%s4170_s3 + $0x94] sm:$0xf] %vm2218_vm1, %v2809_v16  ;;  %v1385_v24 = vpop.f32.mrb[82].mxu0  ;;  %v1674_v27 = vpop.f32.mrb[82].mxu1  ;;  %v146_v21 = vld [vmem:[#allocation2 + $0x170] sm:$0xff] }
 0x1c9   :  { %2512 = vst.msk [vmem:[%s4171_s4 + $0x128] sm:$0xff] %vm35_vm0, %v2448_v17  ;;  %v1387_v28 = vpop.f32.mrb[83].mxu0  ;;  %v1806_v29 = vadd.f32 %v1672_v22, %v140_v19  ;;  %v1675_v30 = vadd.f32 %v1674_v27, %v1385_v24  ;;  %v1676_v31 = vpop.f32.mrb[83].mxu1  ;;  %v2327_v27 = vld [vmem:[%s4169_s2 + $0x160] sm:$0xff] }
 0x1ca   :  { %v1936_v32 = vld [vmem:[#allocation2 + $0x130] sm:$0xff]  ;;  %v147_v28 = vld [vmem:[#allocation2 + $0x178] sm:$0xff] }
 0x1cb   :  { %v2810_v34 = vpack.c.bf16 %v1936_v32, %v1936_v32  ;;  %v2449_v35 = vadd.f32 %v2321_v25, %v1936_v32  ;;  %1871 = vst.msk [vmem:[#allocation2 + $0x140] sm:$0xff] %vm35_vm0, %v1806_v29  ;;  %v1807_v36 = vadd.f32 %v1675_v30, %v141_v26 }
 0x1cd   :  { %v1937_v37 = vld [vmem:[#allocation2 + $0x138] sm:$0xff]  ;;  %2257 = vst.msk [vmem:[%s4170_s3 + $0x98] sm:$0xf] %vm2218_vm1, %v2810_v34 }
 0x1ce   :  { %2513 = vst.msk [vmem:[%s4171_s4 + $0x130] sm:$0xff] %vm35_vm0, %v2449_v35  ;;  %v2811_v38 = vpack.c.bf16 %v1937_v37, %v1937_v37  ;;  %v2450_v39 = vadd.f32 %v2322_v33, %v1937_v37  ;;  %1872 = vst.msk [vmem:[#allocation2 + $0x148] sm:$0xff] %vm35_vm0, %v1807_v36  ;;  %v1390_v40 = vpop.f32.mrb[84].mxu0  ;;  %v1679_v42 = vpop.f32.mrb[84].mxu1  ;;  %v2328_v35 = vld [vmem:[%s4169_s2 + $0x168] sm:$0xff] }
 0x1cf   :  { %v1392_v43 = vpop.f32.mrb[85].mxu0  ;;  %v1680_v44 = vadd.f32 %v1679_v42, %v1390_v40  ;;  %v1681_v45 = vpop.f32.mrb[85].mxu1 }
 0x1d0   :  { %2258 = vst.msk [vmem:[%s4170_s3 + $0x9c] sm:$0xf] %vm2218_vm1, %v2811_v38  ;;  %v1393_v46 = vpop.f32.mrb[86].mxu0  ;;  %v1682_v49 = vpop.f32.mrb[86].mxu1  ;;  %v148_v43 = vld [vmem:[#allocation2 + $0x180] sm:$0xff] }
 0x1d1   :  { %2514 = vst.msk [vmem:[%s4171_s4 + $0x138] sm:$0xff] %vm35_vm0, %v2450_v39  ;;  %v1395_v50 = vpop.f32.mrb[87].mxu0  ;;  %v1808_v51 = vadd.f32 %v1680_v44, %v142_v41  ;;  %v1683_v52 = vadd.f32 %v1682_v49, %v1393_v46  ;;  %v1684_v53 = vpop.f32.mrb[87].mxu1  ;;  %v2329_v49 = vld [vmem:[%s4169_s2 + $0x170] sm:$0xff] }
 0x1d2   :  { %v1938_v54 = vld [vmem:[#allocation2 + $0x140] sm:$0xff]  ;;  %v149_v50 = vld [vmem:[#allocation2 + $0x188] sm:$0xff] }
 0x1d3   :  { %v2812_v56 = vpack.c.bf16 %v1938_v54, %v1938_v54  ;;  %v2451_v57 = vadd.f32 %v2323_v47, %v1938_v54  ;;  %1873 = vst.msk [vmem:[#allocation2 + $0x150] sm:$0xff] %vm35_vm0, %v1808_v51  ;;  %v1809_v58 = vadd.f32 %v1683_v52, %v143_v48 }
 0x1d5   :  { %v1939_v59 = vld [vmem:[#allocation2 + $0x148] sm:$0xff]  ;;  %2259 = vst.msk [vmem:[%s4170_s3 + $0xa0] sm:$0xf] %vm2218_vm1, %v2812_v56 }
 0x1d6   :  { %2515 = vst.msk [vmem:[%s4171_s4 + $0x140] sm:$0xff] %vm35_vm0, %v2451_v57  ;;  %v2813_v60 = vpack.c.bf16 %v1939_v59, %v1939_v59  ;;  %v2452_v61 = vadd.f32 %v2324_v55, %v1939_v59  ;;  %1874 = vst.msk [vmem:[#allocation2 + $0x158] sm:$0xff] %vm35_vm0, %v1809_v58  ;;  %v1398_v62 = vpop.f32.mrb[88].mxu0  ;;  %v1687_v0 = vpop.f32.mrb[88].mxu1  ;;  %v2330_v57 = vld [vmem:[%s4169_s2 + $0x178] sm:$0xff] }
 0x1d7   :  { %v1400_v1 = vpop.f32.mrb[89].mxu0  ;;  %v1688_v2 = vadd.f32 %v1687_v0, %v1398_v62  ;;  %v1689_v3 = vpop.f32.mrb[89].mxu1 }
 0x1d8   :  { %2260 = vst.msk [vmem:[%s4170_s3 + $0xa4] sm:$0xf] %vm2218_vm1, %v2813_v60  ;;  %v1401_v4 = vpop.f32.mrb[90].mxu0  ;;  %v1690_v7 = vpop.f32.mrb[90].mxu1  ;;  %v150_v1 = vld [vmem:[#allocation2 + $0x190] sm:$0xff] }
 0x1d9   :  { %2516 = vst.msk [vmem:[%s4171_s4 + $0x148] sm:$0xff] %vm35_vm0, %v2452_v61  ;;  %v1403_v8 = vpop.f32.mrb[91].mxu0  ;;  %v1810_v9 = vadd.f32 %v1688_v2, %v144_v63  ;;  %v1691_v10 = vadd.f32 %v1690_v7, %v1401_v4  ;;  %v1692_v11 = vpop.f32.mrb[91].mxu1  ;;  %v2331_v7 = vld [vmem:[%s4169_s2 + $0x180] sm:$0xff] }
 0x1da   :  { %v1940_v12 = vld [vmem:[#allocation2 + $0x150] sm:$0xff]  ;;  %v151_v8 = vld [vmem:[#allocation2 + $0x198] sm:$0xff] }
 0x1db   :  { %v2814_v14 = vpack.c.bf16 %v1940_v12, %v1940_v12  ;;  %v2453_v15 = vadd.f32 %v2325_v5, %v1940_v12  ;;  %1875 = vst.msk [vmem:[#allocation2 + $0x160] sm:$0xff] %vm35_vm0, %v1810_v9  ;;  %v1811_v16 = vadd.f32 %v1691_v10, %v145_v6 }
 0x1dd   :  { %v1941_v17 = vld [vmem:[#allocation2 + $0x158] sm:$0xff]  ;;  %2261 = vst.msk [vmem:[%s4170_s3 + $0xa8] sm:$0xf] %vm2218_vm1, %v2814_v14 }
 0x1de   :  { %2517 = vst.msk [vmem:[%s4171_s4 + $0x150] sm:$0xff] %vm35_vm0, %v2453_v15  ;;  %v2815_v18 = vpack.c.bf16 %v1941_v17, %v1941_v17  ;;  %v2454_v19 = vadd.f32 %v2326_v13, %v1941_v17  ;;  %1876 = vst.msk [vmem:[#allocation2 + $0x168] sm:$0xff] %vm35_vm0, %v1811_v16  ;;  %v1406_v20 = vpop.f32.mrb[92].mxu0  ;;  %v1695_v22 = vpop.f32.mrb[92].mxu1  ;;  %v2332_v15 = vld [vmem:[%s4169_s2 + $0x188] sm:$0xff] }
 0x1df   :  { %v1408_v23 = vpop.f32.mrb[93].mxu0  ;;  %v1696_v24 = vadd.f32 %v1695_v22, %v1406_v20  ;;  %v1697_v25 = vpop.f32.mrb[93].mxu1 }
 0x1e0   :  { %2262 = vst.msk [vmem:[%s4170_s3 + $0xac] sm:$0xf] %vm2218_vm1, %v2815_v18  ;;  %v1409_v26 = vpop.f32.mrb[94].mxu0  ;;  %v1698_v29 = vpop.f32.mrb[94].mxu1  ;;  %v152_v23 = vld [vmem:[#allocation2 + $0x1a0] sm:$0xff] }
 0x1e1   :  { %2518 = vst.msk [vmem:[%s4171_s4 + $0x158] sm:$0xff] %vm35_vm0, %v2454_v19  ;;  %v1411_v30 = vpop.f32.mrb[95].mxu0  ;;  %v1812_v31 = vadd.f32 %v1696_v24, %v146_v21  ;;  %v1699_v32 = vadd.f32 %v1698_v29, %v1409_v26  ;;  %v1700_v33 = vpop.f32.mrb[95].mxu1  ;;  %v2333_v29 = vld [vmem:[%s4169_s2 + $0x190] sm:$0xff] }
 0x1e2   :  { %v1942_v34 = vld [vmem:[#allocation2 + $0x160] sm:$0xff]  ;;  %v153_v30 = vld [vmem:[#allocation2 + $0x1a8] sm:$0xff] }
 0x1e3   :  { %v2816_v36 = vpack.c.bf16 %v1942_v34, %v1942_v34  ;;  %v2455_v37 = vadd.f32 %v2327_v27, %v1942_v34  ;;  %1877 = vst.msk [vmem:[#allocation2 + $0x170] sm:$0xff] %vm35_vm0, %v1812_v31  ;;  %v1813_v38 = vadd.f32 %v1699_v32, %v147_v28 }
 0x1e5   :  { %v1943_v39 = vld [vmem:[#allocation2 + $0x168] sm:$0xff]  ;;  %2263 = vst.msk [vmem:[%s4170_s3 + $0xb0] sm:$0xf] %vm2218_vm1, %v2816_v36 }
 0x1e6   :  { %2519 = vst.msk [vmem:[%s4171_s4 + $0x160] sm:$0xff] %vm35_vm0, %v2455_v37  ;;  %v2817_v40 = vpack.c.bf16 %v1943_v39, %v1943_v39  ;;  %v2456_v41 = vadd.f32 %v2328_v35, %v1943_v39  ;;  %1878 = vst.msk [vmem:[#allocation2 + $0x178] sm:$0xff] %vm35_vm0, %v1813_v38  ;;  %v1414_v42 = vpop.f32.mrb[96].mxu0  ;;  %v1703_v44 = vpop.f32.mrb[96].mxu1  ;;  %v2334_v37 = vld [vmem:[%s4169_s2 + $0x198] sm:$0xff] }
 0x1e7   :  { %v1416_v45 = vpop.f32.mrb[97].mxu0  ;;  %v1704_v46 = vadd.f32 %v1703_v44, %v1414_v42  ;;  %v1705_v47 = vpop.f32.mrb[97].mxu1 }
 0x1e8   :  { %2264 = vst.msk [vmem:[%s4170_s3 + $0xb4] sm:$0xf] %vm2218_vm1, %v2817_v40  ;;  %v1417_v48 = vpop.f32.mrb[98].mxu0  ;;  %v1706_v51 = vpop.f32.mrb[98].mxu1  ;;  %v154_v45 = vld [vmem:[#allocation2 + $0x1b0] sm:$0xff] }
 0x1e9   :  { %2520 = vst.msk [vmem:[%s4171_s4 + $0x168] sm:$0xff] %vm35_vm0, %v2456_v41  ;;  %v1419_v52 = vpop.f32.mrb[99].mxu0  ;;  %v1814_v53 = vadd.f32 %v1704_v46, %v148_v43  ;;  %v1707_v54 = vadd.f32 %v1706_v51, %v1417_v48  ;;  %v1708_v55 = vpop.f32.mrb[99].mxu1  ;;  %v2335_v51 = vld [vmem:[%s4169_s2 + $0x1a0] sm:$0xff] }
 0x1ea   :  { %v1944_v56 = vld [vmem:[#allocation2 + $0x170] sm:$0xff]  ;;  %v155_v52 = vld [vmem:[#allocation2 + $0x1b8] sm:$0xff] }
 0x1eb   :  { %v2818_v58 = vpack.c.bf16 %v1944_v56, %v1944_v56  ;;  %v2457_v59 = vadd.f32 %v2329_v49, %v1944_v56  ;;  %1879 = vst.msk [vmem:[#allocation2 + $0x180] sm:$0xff] %vm35_vm0, %v1814_v53  ;;  %v1815_v60 = vadd.f32 %v1707_v54, %v149_v50 }
 0x1ed   :  { %v1945_v61 = vld [vmem:[#allocation2 + $0x178] sm:$0xff]  ;;  %2265 = vst.msk [vmem:[%s4170_s3 + $0xb8] sm:$0xf] %vm2218_vm1, %v2818_v58 }
 0x1ee   :  { %2521 = vst.msk [vmem:[%s4171_s4 + $0x170] sm:$0xff] %vm35_vm0, %v2457_v59  ;;  %v2819_v62 = vpack.c.bf16 %v1945_v61, %v1945_v61  ;;  %v2458_v63 = vadd.f32 %v2330_v57, %v1945_v61  ;;  %1880 = vst.msk [vmem:[#allocation2 + $0x188] sm:$0xff] %vm35_vm0, %v1815_v60  ;;  %v1422_v0 = vpop.f32.mrb[100].mxu0  ;;  %v1711_v2 = vpop.f32.mrb[100].mxu1  ;;  %v2336_v59 = vld [vmem:[%s4169_s2 + $0x1a8] sm:$0xff] }
 0x1ef   :  { %v1424_v3 = vpop.f32.mrb[101].mxu0  ;;  %v1712_v4 = vadd.f32 %v1711_v2, %v1422_v0  ;;  %v1713_v5 = vpop.f32.mrb[101].mxu1 }
 0x1f0   :  { %2266 = vst.msk [vmem:[%s4170_s3 + $0xbc] sm:$0xf] %vm2218_vm1, %v2819_v62  ;;  %v1425_v6 = vpop.f32.mrb[102].mxu0  ;;  %v1714_v9 = vpop.f32.mrb[102].mxu1  ;;  %v156_v3 = vld [vmem:[#allocation2 + $0x1c0] sm:$0xff] }
 0x1f1   :  { %2522 = vst.msk [vmem:[%s4171_s4 + $0x178] sm:$0xff] %vm35_vm0, %v2458_v63  ;;  %v1427_v10 = vpop.f32.mrb[103].mxu0  ;;  %v1816_v11 = vadd.f32 %v1712_v4, %v150_v1  ;;  %v1715_v12 = vadd.f32 %v1714_v9, %v1425_v6  ;;  %v1716_v13 = vpop.f32.mrb[103].mxu1  ;;  %v2337_v9 = vld [vmem:[%s4169_s2 + $0x1b0] sm:$0xff] }
 0x1f2   :  { %v1946_v14 = vld [vmem:[#allocation2 + $0x180] sm:$0xff]  ;;  %v157_v10 = vld [vmem:[#allocation2 + $0x1c8] sm:$0xff] }
 0x1f3   :  { %v2820_v16 = vpack.c.bf16 %v1946_v14, %v1946_v14  ;;  %v2459_v17 = vadd.f32 %v2331_v7, %v1946_v14  ;;  %1881 = vst.msk [vmem:[#allocation2 + $0x190] sm:$0xff] %vm35_vm0, %v1816_v11  ;;  %v1817_v18 = vadd.f32 %v1715_v12, %v151_v8 }
 0x1f5   :  { %v1947_v19 = vld [vmem:[#allocation2 + $0x188] sm:$0xff]  ;;  %2267 = vst.msk [vmem:[%s4170_s3 + $0xc0] sm:$0xf] %vm2218_vm1, %v2820_v16 }
 0x1f6   :  { %2523 = vst.msk [vmem:[%s4171_s4 + $0x180] sm:$0xff] %vm35_vm0, %v2459_v17  ;;  %v2821_v20 = vpack.c.bf16 %v1947_v19, %v1947_v19  ;;  %v2460_v21 = vadd.f32 %v2332_v15, %v1947_v19  ;;  %1882 = vst.msk [vmem:[#allocation2 + $0x198] sm:$0xff] %vm35_vm0, %v1817_v18  ;;  %v1430_v22 = vpop.f32.mrb[104].mxu0  ;;  %v1719_v24 = vpop.f32.mrb[104].mxu1  ;;  %v2338_v17 = vld [vmem:[%s4169_s2 + $0x1b8] sm:$0xff] }
 0x1f7   :  { %v1432_v25 = vpop.f32.mrb[105].mxu0  ;;  %v1720_v26 = vadd.f32 %v1719_v24, %v1430_v22  ;;  %v1721_v27 = vpop.f32.mrb[105].mxu1 }
 0x1f8   :  { %2268 = vst.msk [vmem:[%s4170_s3 + $0xc4] sm:$0xf] %vm2218_vm1, %v2821_v20  ;;  %v1433_v28 = vpop.f32.mrb[106].mxu0  ;;  %v1722_v31 = vpop.f32.mrb[106].mxu1  ;;  %v158_v25 = vld [vmem:[#allocation2 + $0x1d0] sm:$0xff] }
 0x1f9   :  { %2524 = vst.msk [vmem:[%s4171_s4 + $0x188] sm:$0xff] %vm35_vm0, %v2460_v21  ;;  %v1435_v32 = vpop.f32.mrb[107].mxu0  ;;  %v1818_v33 = vadd.f32 %v1720_v26, %v152_v23  ;;  %v1723_v34 = vadd.f32 %v1722_v31, %v1433_v28  ;;  %v1724_v35 = vpop.f32.mrb[107].mxu1  ;;  %v2339_v31 = vld [vmem:[%s4169_s2 + $0x1c0] sm:$0xff] }
 0x1fa   :  { %v1948_v36 = vld [vmem:[#allocation2 + $0x190] sm:$0xff]  ;;  %v159_v32 = vld [vmem:[#allocation2 + $0x1d8] sm:$0xff] }
 0x1fb   :  { %v2822_v38 = vpack.c.bf16 %v1948_v36, %v1948_v36  ;;  %v2461_v39 = vadd.f32 %v2333_v29, %v1948_v36  ;;  %1883 = vst.msk [vmem:[#allocation2 + $0x1a0] sm:$0xff] %vm35_vm0, %v1818_v33  ;;  %v1819_v40 = vadd.f32 %v1723_v34, %v153_v30 }
 0x1fd   :  { %v1949_v41 = vld [vmem:[#allocation2 + $0x198] sm:$0xff]  ;;  %2269 = vst.msk [vmem:[%s4170_s3 + $0xc8] sm:$0xf] %vm2218_vm1, %v2822_v38 }
 0x1fe   :  { %2525 = vst.msk [vmem:[%s4171_s4 + $0x190] sm:$0xff] %vm35_vm0, %v2461_v39  ;;  %v2823_v42 = vpack.c.bf16 %v1949_v41, %v1949_v41  ;;  %v2462_v43 = vadd.f32 %v2334_v37, %v1949_v41  ;;  %1884 = vst.msk [vmem:[#allocation2 + $0x1a8] sm:$0xff] %vm35_vm0, %v1819_v40  ;;  %v1438_v44 = vpop.f32.mrb[108].mxu0  ;;  %v1727_v46 = vpop.f32.mrb[108].mxu1  ;;  %v2340_v39 = vld [vmem:[%s4169_s2 + $0x1c8] sm:$0xff] }
 0x1ff   :  { %v1440_v47 = vpop.f32.mrb[109].mxu0  ;;  %v1728_v48 = vadd.f32 %v1727_v46, %v1438_v44  ;;  %v1729_v49 = vpop.f32.mrb[109].mxu1 }
 0x200   :  { %2270 = vst.msk [vmem:[%s4170_s3 + $0xcc] sm:$0xf] %vm2218_vm1, %v2823_v42  ;;  %v1441_v50 = vpop.f32.mrb[110].mxu0  ;;  %v1730_v53 = vpop.f32.mrb[110].mxu1  ;;  %v160_v47 = vld [vmem:[#allocation2 + $0x1e0] sm:$0xff] }
 0x201   :  { %2526 = vst.msk [vmem:[%s4171_s4 + $0x198] sm:$0xff] %vm35_vm0, %v2462_v43  ;;  %v1443_v54 = vpop.f32.mrb[111].mxu0  ;;  %v1820_v55 = vadd.f32 %v1728_v48, %v154_v45  ;;  %v1731_v56 = vadd.f32 %v1730_v53, %v1441_v50  ;;  %v1732_v57 = vpop.f32.mrb[111].mxu1  ;;  %v2341_v53 = vld [vmem:[%s4169_s2 + $0x1d0] sm:$0xff] }
 0x202   :  { %v1950_v58 = vld [vmem:[#allocation2 + $0x1a0] sm:$0xff]  ;;  %v161_v54 = vld [vmem:[#allocation2 + $0x1e8] sm:$0xff] }
 0x203   :  { %v2824_v60 = vpack.c.bf16 %v1950_v58, %v1950_v58  ;;  %v2463_v61 = vadd.f32 %v2335_v51, %v1950_v58  ;;  %1885 = vst.msk [vmem:[#allocation2 + $0x1b0] sm:$0xff] %vm35_vm0, %v1820_v55  ;;  %v1821_v62 = vadd.f32 %v1731_v56, %v155_v52 }
 0x205   :  { %v1951_v63 = vld [vmem:[#allocation2 + $0x1a8] sm:$0xff]  ;;  %2271 = vst.msk [vmem:[%s4170_s3 + $0xd0] sm:$0xf] %vm2218_vm1, %v2824_v60 }
 0x206   :  { %2527 = vst.msk [vmem:[%s4171_s4 + $0x1a0] sm:$0xff] %vm35_vm0, %v2463_v61  ;;  %v2825_v0 = vpack.c.bf16 %v1951_v63, %v1951_v63  ;;  %v2464_v1 = vadd.f32 %v2336_v59, %v1951_v63  ;;  %1886 = vst.msk [vmem:[#allocation2 + $0x1b8] sm:$0xff] %vm35_vm0, %v1821_v62  ;;  %v1446_v2 = vpop.f32.mrb[112].mxu0  ;;  %v2342_v61 = vld [vmem:[%s4169_s2 + $0x1d8] sm:$0xff] }
 0x207   :  { %v1735_v4 = vpop.f32.mrb[112].mxu1  ;;  %v1448_v5 = vpop.f32.mrb[113].mxu0 }
 0x208   :  { %2272 = vst.msk [vmem:[%s4170_s3 + $0xd4] sm:$0xf] %vm2218_vm1, %v2825_v0  ;;  %v1736_v6 = vadd.f32 %v1735_v4, %v1446_v2  ;;  %v1737_v7 = vpop.f32.mrb[113].mxu1  ;;  %v1449_v8 = vpop.f32.mrb[114].mxu0  ;;  %v162_v5 = vld [vmem:[#allocation2 + $0x1f0] sm:$0xff] }
 0x209   :  { %2528 = vst.msk [vmem:[%s4171_s4 + $0x1a8] sm:$0xff] %vm35_vm0, %v2464_v1  ;;  %v1738_v11 = vpop.f32.mrb[114].mxu1  ;;  %v1451_v12 = vpop.f32.mrb[115].mxu0 }
 0x20a   :  { %v1822_v13 = vadd.f32 %v1736_v6, %v156_v3  ;;  %v1739_v14 = vadd.f32 %v1738_v11, %v1449_v8  ;;  %v1740_v15 = vpop.f32.mrb[115].mxu1  ;;  %v1952_v16 = vld [vmem:[#allocation2 + $0x1b0] sm:$0xff]  ;;  %v2343_v11 = vld [vmem:[%s4169_s2 + $0x1e0] sm:$0xff]  ;;  %v163_v12 = vld [vmem:[#allocation2 + $0x1f8] sm:$0xff] }
 0x20b   :  { %v2826_v18 = vpack.c.bf16 %v1952_v16, %v1952_v16  ;;  %v2465_v19 = vadd.f32 %v2337_v9, %v1952_v16 }
 0x20c   :  { %1887 = vst.msk [vmem:[#allocation2 + $0x1c0] sm:$0xff] %vm35_vm0, %v1822_v13  ;;  %v1823_v20 = vadd.f32 %v1739_v14, %v157_v10 }
 0x20d   :  { %v1953_v21 = vld [vmem:[#allocation2 + $0x1b8] sm:$0xff]  ;;  %2273 = vst.msk [vmem:[%s4170_s3 + $0xd8] sm:$0xf] %vm2218_vm1, %v2826_v18 }
 0x20e   :  { %2529 = vst.msk [vmem:[%s4171_s4 + $0x1b0] sm:$0xff] %vm35_vm0, %v2465_v19  ;;  %v2827_v22 = vpack.c.bf16 %v1953_v21, %v1953_v21  ;;  %v2466_v23 = vadd.f32 %v2338_v17, %v1953_v21  ;;  %1888 = vst.msk [vmem:[#allocation2 + $0x1c8] sm:$0xff] %vm35_vm0, %v1823_v20  ;;  %v1454_v24 = vpop.f32.mrb[116].mxu0  ;;  %v2344_v19 = vld [vmem:[%s4169_s2 + $0x1e8] sm:$0xff] }
 0x20f   :  { %v1743_v26 = vpop.f32.mrb[116].mxu1  ;;  %v1456_v27 = vpop.f32.mrb[117].mxu0 }
 0x210   :  { %2274 = vst.msk [vmem:[%s4170_s3 + $0xdc] sm:$0xf] %vm2218_vm1, %v2827_v22  ;;  %v1744_v28 = vadd.f32 %v1743_v26, %v1454_v24  ;;  %v1745_v29 = vpop.f32.mrb[117].mxu1  ;;  %v1457_v30 = vpop.f32.mrb[118].mxu0  ;;  %v2345_v26 = vld [vmem:[%s4169_s2 + $0x1f0] sm:$0xff] }
 0x211   :  { %2530 = vst.msk [vmem:[%s4171_s4 + $0x1b8] sm:$0xff] %vm35_vm0, %v2466_v23  ;;  %v1746_v33 = vpop.f32.mrb[118].mxu1  ;;  %v1459_v34 = vpop.f32.mrb[119].mxu0 }
 0x212   :  { %v1824_v35 = vadd.f32 %v1744_v28, %v158_v25  ;;  %v1747_v36 = vadd.f32 %v1746_v33, %v1457_v30  ;;  %v1748_v37 = vpop.f32.mrb[119].mxu1  ;;  %v2346_v28 = vld [vmem:[%s4169_s2 + $0x1f8] sm:$0xff] }
 0x213   :  { %v1954_v38 = vld [vmem:[#allocation2 + $0x1c0] sm:$0xff] }
 0x214   :  { %v2828_v40 = vpack.c.bf16 %v1954_v38, %v1954_v38  ;;  %v2467_v41 = vadd.f32 %v2339_v31, %v1954_v38  ;;  %1889 = vst.msk [vmem:[#allocation2 + $0x1d0] sm:$0xff] %vm35_vm0, %v1824_v35  ;;  %v1825_v42 = vadd.f32 %v1747_v36, %v159_v32 }
 0x215   :  { %v1955_v43 = vld [vmem:[#allocation2 + $0x1c8] sm:$0xff] }
 0x216   :  { %2275 = vst.msk [vmem:[%s4170_s3 + $0xe0] sm:$0xf] %vm2218_vm1, %v2828_v40  ;;  %v2829_v44 = vpack.c.bf16 %v1955_v43, %v1955_v43  ;;  %v2468_v45 = vadd.f32 %v2340_v39, %v1955_v43  ;;  %v1462_v46 = vpop.f32.mrb[120].mxu0 }
 0x217   :  { %2531 = vst.msk [vmem:[%s4171_s4 + $0x1c0] sm:$0xff] %vm35_vm0, %v2467_v41  ;;  %1890 = vst.msk [vmem:[#allocation2 + $0x1d8] sm:$0xff] %vm35_vm0, %v1825_v42  ;;  %v1751_v48 = vpop.f32.mrb[120].mxu1  ;;  %v1464_v49 = vpop.f32.mrb[121].mxu0 }
 0x218   :  { %2276 = vst.msk [vmem:[%s4170_s3 + $0xe4] sm:$0xf] %vm2218_vm1, %v2829_v44  ;;  %v1752_v50 = vadd.f32 %v1751_v48, %v1462_v46  ;;  %v1753_v51 = vpop.f32.mrb[121].mxu1  ;;  %v1465_v52 = vpop.f32.mrb[122].mxu0 }
 0x219   :  { %2532 = vst.msk [vmem:[%s4171_s4 + $0x1c8] sm:$0xff] %vm35_vm0, %v2468_v45  ;;  %v1754_v55 = vpop.f32.mrb[122].mxu1  ;;  %v1467_v56 = vpop.f32.mrb[123].mxu0 }
 0x21a   :  { %v1826_v57 = vadd.f32 %v1752_v50, %v160_v47  ;;  %v1755_v58 = vadd.f32 %v1754_v55, %v1465_v52  ;;  %v1756_v59 = vpop.f32.mrb[123].mxu1 }
 0x21b   :  { %v1956_v60 = vld [vmem:[#allocation2 + $0x1d0] sm:$0xff] }
 0x21c   :  { %v2830_v62 = vpack.c.bf16 %v1956_v60, %v1956_v60  ;;  %v2469_v63 = vadd.f32 %v2341_v53, %v1956_v60  ;;  %1891 = vst.msk [vmem:[#allocation2 + $0x1e0] sm:$0xff] %vm35_vm0, %v1826_v57  ;;  %v1827_v0 = vadd.f32 %v1755_v58, %v161_v54 }
 0x21e   :  { %v1957_v1 = vld [vmem:[#allocation2 + $0x1d8] sm:$0xff]  ;;  %2277 = vst.msk [vmem:[%s4170_s3 + $0xe8] sm:$0xf] %vm2218_vm1, %v2830_v62  ;;  %v1470_v4 = vpop.f32.mrb[124].mxu0 }
 0x21f   :  { %2533 = vst.msk [vmem:[%s4171_s4 + $0x1d0] sm:$0xff] %vm35_vm0, %v2469_v63  ;;  %v2831_v2 = vpack.c.bf16 %v1957_v1, %v1957_v1  ;;  %v2470_v3 = vadd.f32 %v2342_v61, %v1957_v1  ;;  %1892 = vst.msk [vmem:[#allocation2 + $0x1e8] sm:$0xff] %vm35_vm0, %v1827_v0  ;;  %v1759_v6 = vpop.f32.mrb[124].mxu1  ;;  %v1472_v7 = vpop.f32.mrb[125].mxu0 }
 0x220   :  { %v1760_v8 = vadd.f32 %v1759_v6, %v1470_v4  ;;  %v1761_v9 = vpop.f32.mrb[125].mxu1  ;;  %v1473_v10 = vpop.f32.mrb[126].mxu0 }
 0x221   :  { %2278 = vst.msk [vmem:[%s4170_s3 + $0xec] sm:$0xf] %vm2218_vm1, %v2831_v2  ;;  %v1762_v13 = vpop.f32.mrb[126].mxu1  ;;  %v1475_v14 = vpop.f32.mrb[127].mxu0 }
 0x222   :  { %2534 = vst.msk [vmem:[%s4171_s4 + $0x1d8] sm:$0xff] %vm35_vm0, %v2470_v3  ;;  %v1828_v15 = vadd.f32 %v1760_v8, %v162_v5  ;;  %v1763_v16 = vadd.f32 %v1762_v13, %v1473_v10  ;;  %v1764_v17 = vpop.f32.mrb[127].mxu1 }
 0x223   :  { %v1958_v18 = vld [vmem:[#allocation2 + $0x1e0] sm:$0xff] }
 0x224   :  { %v2832_v20 = vpack.c.bf16 %v1958_v18, %v1958_v18  ;;  %v2471_v21 = vadd.f32 %v2343_v11, %v1958_v18  ;;  %1893 = vst.msk [vmem:[#allocation2 + $0x1f0] sm:$0xff] %vm35_vm0, %v1828_v15  ;;  %v1829_v22 = vadd.f32 %v1763_v16, %v163_v12 }
 0x226   :  { %v1959_v23 = vld [vmem:[#allocation2 + $0x1e8] sm:$0xff]  ;;  %2279 = vst.msk [vmem:[%s4170_s3 + $0xf0] sm:$0xf] %vm2218_vm1, %v2832_v20 }
 0x227   :  { %2535 = vst.msk [vmem:[%s4171_s4 + $0x1e0] sm:$0xff] %vm35_vm0, %v2471_v21  ;;  %v2833_v24 = vpack.c.bf16 %v1959_v23, %v1959_v23  ;;  %v2472_v25 = vadd.f32 %v2344_v19, %v1959_v23  ;;  %1894 = vst.msk [vmem:[#allocation2 + $0x1f8] sm:$0xff] %vm35_vm0, %v1829_v22 }
 0x229   :  { %2280 = vst.msk [vmem:[%s4170_s3 + $0xf4] sm:$0xf] %vm2218_vm1, %v2833_v24 }
 0x22a   :  { %2536 = vst.msk [vmem:[%s4171_s4 + $0x1e8] sm:$0xff] %vm35_vm0, %v2472_v25 }
 0x22b   :  { %v1960_v27 = vld [vmem:[#allocation2 + $0x1f0] sm:$0xff] }
 0x22c   :  { %v2834_v29 = vpack.c.bf16 %v1960_v27, %v1960_v27  ;;  %v2473_v30 = vadd.f32 %v2345_v26, %v1960_v27 }
 0x22e   :  { %v1961_v31 = vld [vmem:[#allocation2 + $0x1f8] sm:$0xff]  ;;  %2281 = vst.msk [vmem:[%s4170_s3 + $0xf8] sm:$0xf] %vm2218_vm1, %v2834_v29 }
 0x22f   :  { %2537 = vst.msk [vmem:[%s4171_s4 + $0x1f0] sm:$0xff] %vm35_vm0, %v2473_v30  ;;  %v2835_v32 = vpack.c.bf16 %v1961_v31, %v1961_v31  ;;  %v2474_v33 = vadd.f32 %v2346_v28, %v1961_v31 }
 0x231   :  { %2282 = vst.msk [vmem:[%s4170_s3 + $0xfc] sm:$0xf] %vm2218_vm1, %v2835_v32 }
 0x232   :  { %2538 = vst.msk [vmem:[%s4171_s4 + $0x1f8] sm:$0xff] %vm35_vm0, %v2474_v33 }
 0x233   :  { %2547 = vsyncpa [#allocation4], 1 }

</bundles_post_ra>
